<compile_context>
chip_gen: v6e
topology: v6e:2x2x1
jax: 0.10.0
libtpu: 0.0.40
codegen_flags: <defaults>
</compile_context>

<pallas_src>
import functools
import math

import jax
import jax.numpy as jnp
from jax.experimental import pallas as pl
from jax.experimental.pallas import tpu as pltpu


# ----------------------------------------------------------------------------
# Parameter / cache setup (plain JAX glue, mirrors _init_as_common)
# ----------------------------------------------------------------------------
def _centered_dft_matrix(n: int, inverse: bool = False) -> jnp.ndarray:
    """Matrix M with M @ x == fftshift((i)fft(ifftshift(x))) for length-n x."""
    eye = jnp.eye(n, dtype=jnp.complex64)
    shifted = jnp.fft.ifftshift(eye, axes=0)
    tx = jnp.fft.ifft(shifted, axis=0) if inverse else jnp.fft.fft(shifted, axis=0)
    return jnp.fft.fftshift(tx, axes=0)


def _build_transfer(wl, d, dx, dy, grid_size, paraxial=False):
    """Angular-spectrum transfer function, shape (N_d, N_lambda, H, W), complex64."""
    H, W = grid_size
    dfy = 1.0 / (H * dy)
    dfx = 1.0 / (W * dx)
    fy = (jnp.arange(H, dtype=jnp.float32) - H // 2) * dfy              # (H,)
    fx = (jnp.arange(W, dtype=jnp.float32) - W // 2) * dfx              # (W,)
    rou2 = fx[None, :] ** 2 + fy[:, None] ** 2                          # (H, W)
    wl = jnp.atleast_1d(jnp.asarray(wl, jnp.float32))                   # (Nl,)
    d = jnp.atleast_1d(jnp.asarray(d, jnp.float32))                     # (Nd,)
    kd = (2.0 * jnp.pi / wl)[None, :] * d[:, None]                      # (Nd, Nl)
    if paraxial:
        phase_scale = (-jnp.pi * wl)[None, :] * d[:, None]              # (Nd, Nl)
        argument = phase_scale[..., None, None] * rou2 + kd[..., None, None]
        return jnp.exp(1j * argument).astype(jnp.complex64)
    # TODO(synk): the torch module also emits warnings.warn for coarse spacing /
    # ignored cache; host-side warnings have no kernel equivalent and are skipped.
    under = 1.0 - (wl ** 2)[:, None, None] * rou2[None]                 # (Nl, H, W)
    mask = under > 0
    factor = jnp.where(mask, jnp.sqrt(jnp.where(mask, under, 1.0)), 0.0)
    argument = kd[..., None, None] * factor[None]                       # (Nd, Nl, H, W)
    transfer = jnp.exp(1j * argument)
    transfer = jnp.where(mask[None], transfer, 0.0)
    return transfer.astype(jnp.complex64)


def _vmem_capacity_bytes() -> int:
    try:
        return int(pltpu.get_tpu_info().vmem_capacity_bytes)
    except Exception:
        return 64 * 2 ** 20        # conservative (v7x-sized) fallback


def _target_mxu_rows() -> int:
    try:
        kind = jax.devices()[0].device_kind.lower()
    except Exception:
        kind = ""
    return 128 if "v5" in kind else 256   # v5e MXU is 128-wide; v6e/v7x are 256


def _pick_bt(Bl: int, H: int, W: int, target_rows: int, vmem_cap: int) -> int:
    """Images per grid step: divisor of Bl targeting ~MXU-width rows, VMEM-capped."""
    if H % 8 != 0:
        # Keep the in-kernel (Bt,1,H,W)->(Bt*H,W) reshape a pure retile.
        return 1
    # Rough per-image VMEM cost: double-buffered f32 in/out planes (8x) +
    # scratch (2x) + ~12 live f32 intermediates during the matmul stages.
    per_img = H * W * 4 * (8 + 2 + 12)
    cap = max(1, int(0.5 * vmem_cap) // per_img)
    target = max(1, min(target_rows // max(H, 1), 8, Bl, cap))
    best = 1
    for c in range(1, target + 1):
        if Bl % c == 0:
            best = c
    return best


# ----------------------------------------------------------------------------
# Pallas kernel: centered DFT -> complex mult by transfer -> centered inverse DFT
# ----------------------------------------------------------------------------
def _asm_kernel(transfer_resident,
                fhr_ref, fhi_ref, fhs_ref, fhd_ref,
                fwr_ref, fwi_ref, fws_ref, fwd_ref,
                tr_ref, ti_ref, xr_ref, xi_ref,
                or_ref, oi_ref, ur_scr, ui_scr):
    Bt, _, H, W = xr_ref.shape
    inv_hw = jnp.float32(1.0 / (H * W))     # ift normalization, applied exactly once
    mm = fhr_ref.dtype                      # bf16 (default) or f32 matmul operands

    # Grid-invariant DFT matrices and their hoisted Gauss sums / differences
    # (single-copy VMEM residents; nothing is negated or summed per step).
    fh_r, fh_i, fh_s, fh_d = fhr_ref[...], fhi_ref[...], fhs_ref[...], fhd_ref[...]
    fw_r, fw_i, fw_s, fw_d = fwr_ref[...], fwi_ref[...], fws_ref[...], fwd_ref[...]

    def rmul(ar, ai, br, bi, bsum, conj_b):
        # (ar + i*ai) @ (br ± i*bi) with 3 real MXU matmuls (Gauss), f32 accumulation.
        # Data sums are computed in f32, then cast once to the MXU operand dtype.
        p1 = jnp.dot(ar.astype(mm), br, preferred_element_type=jnp.float32)
        p2 = jnp.dot(ai.astype(mm), bi, preferred_element_type=jnp.float32)
        p3 = jnp.dot((ar + ai).astype(mm), bsum, preferred_element_type=jnp.float32)
        if conj_b:   # b = br - i*bi, bsum = br - bi
            return p1 + p2, p3 - p1 + p2
        return p1 - p2, p3 - p1 - p2

    def lmul(ar, ai, asum, br, bi, conj_a):
        # (ar ± i*ai) @ (br + i*bi), matrix on the left.
        p1 = jnp.dot(ar, br.astype(mm), preferred_element_type=jnp.float32)
        p2 = jnp.dot(ai, bi.astype(mm), preferred_element_type=jnp.float32)
        p3 = jnp.dot(asum, (br + bi).astype(mm), preferred_element_type=jnp.float32)
        if conj_a:   # a = ar - i*ai, asum = ar - ai
            return p1 + p2, p3 - p1 + p2
        return p1 - p2, p3 - p1 - p2

    if transfer_resident:
        g = pl.program_id(0)
        t_r = tr_ref[g]          # whole-array VMEM resident, indexed by grid pos
        t_i = ti_ref[g]
    else:
        t_r = tr_ref[0]          # (1, H, W) block; index constant over inner sweep
        t_i = ti_ref[0]

    # Stage 1 (all Bt images folded into the M dimension): Y = X @ F_W^T.
    xr = xr_ref[...].reshape(Bt * H, W)
    xi = xi_ref[...].reshape(Bt * H, W)
    yr, yi = rmul(xr, xi, fw_r, fw_i, fw_s, conj_b=False)

    # Stages 2-3 (short unrolled per-image loop), results go to VMEM scratch:
    #   S = F_H @ Y ; Z = S * transfer ; U = conj(F_H) @ Z
    for b in range(Bt):
        lo, hi = b * H, (b + 1) * H
        sr, si = lmul(fh_r, fh_i, fh_s, yr[lo:hi], yi[lo:hi], conj_a=False)
        zr = sr * t_r - si * t_i
        zi = sr * t_i + si * t_r
        vr, vi = lmul(fh_r, fh_i, fh_d, zr, zi, conj_a=True)
        ur_scr[pl.ds(lo, H), :] = vr
        ui_scr[pl.ds(lo, H), :] = vi

    # Stage 4 (batched): U @ conj(F_W^T), then the single 1/(H*W) scale.
    wr, wi = rmul(ur_scr[...], ui_scr[...], fw_r, fw_i, fw_d, conj_b=True)
    or_ref[...] = (wr * inv_hw).reshape(Bt, 1, H, W)
    oi_ref[...] = (wi * inv_hw).reshape(Bt, 1, H, W)


def angular_spectrum_pallas(pupil: jnp.ndarray, transfer: jnp.ndarray,
                            *, use_bf16: bool = True,
                            planar_output: bool = False):
    """pupil: complex (..., N_d, N_lambda, H, W); transfer: complex (N_d, N_lambda, H, W)."""
    H, W = transfer.shape[-2], transfer.shape[-1]
    assert pupil.shape[-2:] == (H, W), "pupil spatial dims must match transfer"

    # Rank-pad so both have at least the (N_d, N_lambda, H, W) axes.
    if pupil.ndim < 4:
        pupil = pupil.reshape((1,) * (4 - pupil.ndim) + pupil.shape)
    if transfer.ndim < 4:
        transfer = transfer.reshape((1,) * (4 - transfer.ndim) + transfer.shape)

    full_shape = jnp.broadcast_shapes(pupil.shape, transfer.shape)
    Nd, Nl = full_shape[-4], full_shape[-3]
    lead = full_shape[:-4]
    Bl = math.prod(lead) if lead else 1
    G = Nd * Nl

    # Pupil is NOT broadcast over (N_d, N_lambda); broadcast axes are collapsed
    # in the input index_map so the kernel re-reads the same HBM block.
    Nd_p, Nl_p = pupil.shape[-4], pupil.shape[-3]
    Gp = Nd_p * Nl_p
    # TODO(synk): jnp.real/jnp.imag de-interleave passes are unavoidable while
    # the caller hands us complex64; a planar-complex caller could skip them.
    xr = jnp.real(pupil).reshape(Bl, Gp, H, W).astype(jnp.float32)
    xi = jnp.imag(pupil).reshape(Bl, Gp, H, W).astype(jnp.float32)

    transfer_b = jnp.broadcast_to(transfer, (Nd, Nl, H, W)).reshape(G, H, W)
    tr = jnp.real(transfer_b).astype(jnp.float32)
    ti = jnp.imag(transfer_b).astype(jnp.float32)

    # Forward centered-DFT matrices only; the inverse transform reuses them as
    # conj(.) (sign flips in the kernel) plus one 1/(H*W) scale.  All Gauss
    # combinations are precomputed here in f32, then cast once.
    mm_dtype = jnp.bfloat16 if use_bf16 else jnp.float32
    fh = _centered_dft_matrix(H)
    fwt = _centered_dft_matrix(W).T            # pre-transposed for right-multiply
    fh_r, fh_i = jnp.real(fh), jnp.imag(fh)
    fw_r, fw_i = jnp.real(fwt), jnp.imag(fwt)
    mats = [m.astype(mm_dtype) for m in
            (fh_r, fh_i, fh_r + fh_i, fh_r - fh_i,
             fw_r, fw_i, fw_r + fw_i, fw_r - fw_i)]

    # Generation-aware sizing.
    vmem_cap = _vmem_capacity_bytes()
    Bt = _pick_bt(Bl, H, W, _target_mxu_rows(), vmem_cap)
    NB = Bl // Bt
    grid = (G, NB)   # inner (fast) axis = batch: transfer block fixed across it

    # VMEM budget (no double counting): matrices once, in/out blocks x2 buffers,
    # scratch once, ~12 live f32 intermediates, transfer resident-or-blocked.
    itemsize_mm = jnp.dtype(mm_dtype).itemsize
    mat_bytes = 4 * (H * H + W * W) * itemsize_mm
    io_bytes = Bt * H * W * 4 * (2 * 2 + 2 * 2)          # in + out planes, double-buffered
    scratch_bytes = 2 * Bt * H * W * 4
    tmp_bytes = 12 * Bt * H * W * 4
    t_resident_bytes = 2 * G * H * W * 4
    base = mat_bytes + io_bytes + scratch_bytes + tmp_bytes
    transfer_resident = (base + t_resident_bytes) <= int(0.7 * vmem_cap)
    t_bytes = t_resident_bytes if transfer_resident else 2 * 2 * H * W * 4
    needed = base + t_bytes
    vmem_limit = int(min(max(needed * 5 // 4, 32 * 2 ** 20), int(0.85 * vmem_cap)))

    # Grid-invariant DFT matrices: whole-array single-copy VMEM residents.
    mat_spec = pl.BlockSpec(memory_space=pltpu.MemorySpace.VMEM)
    if transfer_resident:
        t_spec = mat_spec                                  # single copy, no buffering
    else:
        # TODO(synk): pipeline_mode=pl.Buffered(1) would also drop the unused
        # second buffer here; kept at default buffering for lowering robustness.
        t_spec = pl.BlockSpec((1, H, W), lambda g, b: (g, 0, 0))

    # Collapse broadcast (N_d, N_lambda) axes of the pupil in the index_map.
    if Nd_p == Nd and Nl_p == Nl:
        p_g = lambda g: g
    elif Nd_p == 1 and Nl_p == 1:
        p_g = lambda g: 0
    elif Nd_p == 1:
        p_g = lambda g: g % Nl
    else:
        p_g = lambda g: g // Nl
    in_img_spec = pl.BlockSpec((Bt, 1, H, W), lambda g, b: (b, p_g(g), 0, 0))
    out_img_spec = pl.BlockSpec((Bt, 1, H, W), lambda g, b: (b, g, 0, 0))

    kernel = functools.partial(_asm_kernel, transfer_resident)
    out_r, out_i = pl.pallas_call(
        kernel,
        out_shape=(jax.ShapeDtypeStruct((Bl, G, H, W), jnp.float32),
                   jax.ShapeDtypeStruct((Bl, G, H, W), jnp.float32)),
        grid_spec=pltpu.PrefetchScalarGridSpec(
            num_scalar_prefetch=0,
            grid=grid,
            in_specs=[mat_spec] * 8 + [t_spec, t_spec, in_img_spec, in_img_spec],
            out_specs=(out_img_spec, out_img_spec),
            scratch_shapes=[pltpu.VMEM((Bt * H, W), jnp.float32),
                            pltpu.VMEM((Bt * H, W), jnp.float32)],
        ),
        compiler_params=pltpu.CompilerParams(
            dimension_semantics=("parallel", "parallel"),
            vmem_limit_bytes=vmem_limit,
        ),
    )(*mats, tr, ti, xr, xi)

    if planar_output:
        return out_r.reshape(full_shape), out_i.reshape(full_shape)
    return jax.lax.complex(out_r, out_i).reshape(full_shape)


# ----------------------------------------------------------------------------
# Pure-JAX reference (FFT-based), for correctness checking
# ----------------------------------------------------------------------------
def _reference(pupil, transfer):
    axes = (-2, -1)

    def ft2(x):
        return jnp.fft.fftshift(jnp.fft.fft2(jnp.fft.ifftshift(x, axes=axes), axes=axes), axes=axes)

    def ift2(x):
        return jnp.fft.fftshift(jnp.fft.ifft2(jnp.fft.ifftshift(x, axes=axes), axes=axes), axes=axes)

    return ift2(ft2(pupil) * transfer)


if __name__ == "__main__":
    # Small, module-consistent shapes: (batch, N_d, N_lambda, H, W) = (2, 2, 3, 16, 16)
    batch, Nd, Nl, H, W = 2, 2, 3, 16, 16

    key = jax.random.PRNGKey(0)
    kr, ki = jax.random.split(key)
    pupil = (jax.random.normal(kr, (batch, Nd, Nl, H, W), dtype=jnp.float32)
             + 1j * jax.random.normal(ki, (batch, Nd, Nl, H, W), dtype=jnp.float32)
             ).astype(jnp.complex64)

    # Deterministic module "parameters" (grid_size, dx, dy, wl, d) -> cached transfer
    wl = jnp.array([0.5, 0.6, 0.7], jnp.float32)   # N_lambda = 3
    d = jnp.array([10.0, 20.0], jnp.float32)       # N_d = 2
    dx = dy = 1.0
    transfer = _build_transfer(wl, d, dx, dy, (H, W), paraxial=False)

    ref = _reference(pupil, transfer)
    scale = float(jnp.max(jnp.abs(ref))) + 1e-6

    # Default hot path: bf16 MXU operands, f32 accumulation.
    out = jax.block_until_ready(angular_spectrum_pallas(pupil, transfer))
    err = float(jnp.max(jnp.abs(out - ref)))
    assert err < 5e-2 * scale, f"bf16 mismatch: max abs err {err}, scale {scale}"

    # f32 fallback (exact-accuracy mode), tighter tolerance.
    out32 = jax.block_until_ready(angular_spectrum_pallas(pupil, transfer, use_bf16=False))
    err32 = float(jnp.max(jnp.abs(out32 - ref)))
    assert err32 < 1e-2 * scale, f"f32 mismatch: max abs err {err32}, scale {scale}"

    # Pupil broadcast over N_d (exercises the index-map broadcast collapse,
    # i.e. no HBM materialization of the broadcast pupil).
    pupil_b = pupil[:, :1]                                  # (2, 1, 3, H, W)
    ref_b = _reference(pupil_b, transfer)
    out_b = jax.block_until_ready(angular_spectrum_pallas(pupil_b, transfer))
    scale_b = float(jnp.max(jnp.abs(ref_b))) + 1e-6
    err_b = float(jnp.max(jnp.abs(out_b - ref_b)))
    assert err_b < 5e-2 * scale_b, f"broadcast mismatch: max abs err {err_b}"

    print("KERNEL_OK")
</pallas_src>

<mosaic_0001>
module attributes {stable_mosaic.version = 11 : i64} {
  func.func @_asm_kernel(%arg0: i32, %arg1: i32, %arg2: memref<16x16xbf16, #tpu.memory_space<vmem>>, %arg3: memref<16x16xbf16, #tpu.memory_space<vmem>>, %arg4: memref<16x16xbf16, #tpu.memory_space<vmem>>, %arg5: memref<16x16xbf16, #tpu.memory_space<vmem>>, %arg6: memref<16x16xbf16, #tpu.memory_space<vmem>>, %arg7: memref<16x16xbf16, #tpu.memory_space<vmem>>, %arg8: memref<16x16xbf16, #tpu.memory_space<vmem>>, %arg9: memref<16x16xbf16, #tpu.memory_space<vmem>>, %arg10: memref<6x16x16xf32, #tpu.memory_space<vmem>>, %arg11: memref<6x16x16xf32, #tpu.memory_space<vmem>>, %arg12: memref<2x1x16x16xf32, #tpu.memory_space<vmem>>, %arg13: memref<2x1x16x16xf32, #tpu.memory_space<vmem>>, %arg14: memref<2x1x16x16xf32, #tpu.memory_space<vmem>>, %arg15: memref<2x1x16x16xf32, #tpu.memory_space<vmem>>, %arg16: memref<32x16xf32, #tpu.memory_space<vmem>>, %arg17: memref<32x16xf32, #tpu.memory_space<vmem>>) attributes {dimension_semantics = [#tpu.dimension_semantics<parallel>, #tpu.dimension_semantics<parallel>], iteration_bounds = array<i64: 6, 1>, scalar_prefetch = 0 : i64, scratch_operands = 2 : i64, tpu.core_type = #tpu.core_type<tc>, window_params = [{pipeline_mode = #tpu.pipeline_mode<synchronous>, transform_indices = @transform_0, window_bounds = array<i64: 16, 16>}, {pipeline_mode = #tpu.pipeline_mode<synchronous>, transform_indices = @transform_1, window_bounds = array<i64: 16, 16>}, {pipeline_mode = #tpu.pipeline_mode<synchronous>, transform_indices = @transform_2, window_bounds = array<i64: 16, 16>}, {pipeline_mode = #tpu.pipeline_mode<synchronous>, transform_indices = @transform_3, window_bounds = array<i64: 16, 16>}, {pipeline_mode = #tpu.pipeline_mode<synchronous>, transform_indices = @transform_4, window_bounds = array<i64: 16, 16>}, {pipeline_mode = #tpu.pipeline_mode<synchronous>, transform_indices = @transform_5, window_bounds = array<i64: 16, 16>}, {pipeline_mode = #tpu.pipeline_mode<synchronous>, transform_indices = @transform_6, window_bounds = array<i64: 16, 16>}, {pipeline_mode = #tpu.pipeline_mode<synchronous>, transform_indices = @transform_7, window_bounds = array<i64: 16, 16>}, {pipeline_mode = #tpu.pipeline_mode<synchronous>, transform_indices = @transform_8, window_bounds = array<i64: 6, 16, 16>}, {pipeline_mode = #tpu.pipeline_mode<synchronous>, transform_indices = @transform_9, window_bounds = array<i64: 6, 16, 16>}, {transform_indices = @transform_10, window_bounds = array<i64: 2, 1, 16, 16>}, {transform_indices = @transform_11, window_bounds = array<i64: 2, 1, 16, 16>}, {transform_indices = @transform_12, window_bounds = array<i64: 2, 1, 16, 16>}, {transform_indices = @transform_13, window_bounds = array<i64: 2, 1, 16, 16>}]} {
    %c0 = arith.constant 0 : index
    %c0_0 = arith.constant 0 : index
    %0 = vector.load %arg2[%c0, %c0_0] : memref<16x16xbf16, #tpu.memory_space<vmem>>, vector<16x16xbf16>
    %c0_1 = arith.constant 0 : index
    %c0_2 = arith.constant 0 : index
    %1 = vector.load %arg3[%c0_1, %c0_2] : memref<16x16xbf16, #tpu.memory_space<vmem>>, vector<16x16xbf16>
    %c0_3 = arith.constant 0 : index
    %c0_4 = arith.constant 0 : index
    %2 = vector.load %arg4[%c0_3, %c0_4] : memref<16x16xbf16, #tpu.memory_space<vmem>>, vector<16x16xbf16>
    %c0_5 = arith.constant 0 : index
    %c0_6 = arith.constant 0 : index
    %3 = vector.load %arg5[%c0_5, %c0_6] : memref<16x16xbf16, #tpu.memory_space<vmem>>, vector<16x16xbf16>
    %c0_7 = arith.constant 0 : index
    %c0_8 = arith.constant 0 : index
    %4 = vector.load %arg6[%c0_7, %c0_8] : memref<16x16xbf16, #tpu.memory_space<vmem>>, vector<16x16xbf16>
    %c0_9 = arith.constant 0 : index
    %c0_10 = arith.constant 0 : index
    %5 = vector.load %arg7[%c0_9, %c0_10] : memref<16x16xbf16, #tpu.memory_space<vmem>>, vector<16x16xbf16>
    %c0_11 = arith.constant 0 : index
    %c0_12 = arith.constant 0 : index
    %6 = vector.load %arg8[%c0_11, %c0_12] : memref<16x16xbf16, #tpu.memory_space<vmem>>, vector<16x16xbf16>
    %c0_13 = arith.constant 0 : index
    %c0_14 = arith.constant 0 : index
    %7 = vector.load %arg9[%c0_13, %c0_14] : memref<16x16xbf16, #tpu.memory_space<vmem>>, vector<16x16xbf16>
    %8 = arith.index_cast %arg0 : i32 to index
    %c0_15 = arith.constant 0 : index
    %c0_16 = arith.constant 0 : index
    %9 = vector.load %arg10[%8, %c0_15, %c0_16] : memref<6x16x16xf32, #tpu.memory_space<vmem>>, vector<1x16x16xf32>
    %10 = vector.shape_cast %9 : vector<1x16x16xf32> to vector<16x16xf32>
    %11 = arith.index_cast %arg0 : i32 to index
    %c0_17 = arith.constant 0 : index
    %c0_18 = arith.constant 0 : index
    %12 = vector.load %arg11[%11, %c0_17, %c0_18] : memref<6x16x16xf32, #tpu.memory_space<vmem>>, vector<1x16x16xf32>
    %13 = vector.shape_cast %12 : vector<1x16x16xf32> to vector<16x16xf32>
    %c0_19 = arith.constant 0 : index
    %c0_20 = arith.constant 0 : index
    %c0_21 = arith.constant 0 : index
    %c0_22 = arith.constant 0 : index
    %14 = vector.load %arg12[%c0_19, %c0_20, %c0_21, %c0_22] : memref<2x1x16x16xf32, #tpu.memory_space<vmem>>, vector<2x1x16x16xf32>
    %15 = vector.shape_cast %14 : vector<2x1x16x16xf32> to vector<32x16xf32>
    %c0_23 = arith.constant 0 : index
    %c0_24 = arith.constant 0 : index
    %c0_25 = arith.constant 0 : index
    %c0_26 = arith.constant 0 : index
    %16 = vector.load %arg13[%c0_23, %c0_24, %c0_25, %c0_26] : memref<2x1x16x16xf32, #tpu.memory_space<vmem>>, vector<2x1x16x16xf32>
    %17 = vector.shape_cast %16 : vector<2x1x16x16xf32> to vector<32x16xf32>
    %18 = arith.truncf %15 : vector<32x16xf32> to vector<32x16xbf16>
    %cst = arith.constant dense<0.000000e+00> : vector<32x16xf32>
    %19 = tpu.matmul %18, %4, %cst {dimension_numbers = #tpu.dot_dimension_numbers<[1], [0], [0], [1], [0, 0, 1, 1], [], []>} : vector<32x16xbf16>, vector<16x16xbf16>, vector<32x16xf32> -> vector<32x16xf32>
    %20 = arith.truncf %17 : vector<32x16xf32> to vector<32x16xbf16>
    %cst_27 = arith.constant dense<0.000000e+00> : vector<32x16xf32>
    %21 = tpu.matmul %20, %5, %cst_27 {dimension_numbers = #tpu.dot_dimension_numbers<[1], [0], [0], [1], [0, 0, 1, 1], [], []>} : vector<32x16xbf16>, vector<16x16xbf16>, vector<32x16xf32> -> vector<32x16xf32>
    %22 = arith.addf %15, %17 : vector<32x16xf32>
    %23 = arith.truncf %22 : vector<32x16xf32> to vector<32x16xbf16>
    %cst_28 = arith.constant dense<0.000000e+00> : vector<32x16xf32>
    %24 = tpu.matmul %23, %6, %cst_28 {dimension_numbers = #tpu.dot_dimension_numbers<[1], [0], [0], [1], [0, 0, 1, 1], [], []>} : vector<32x16xbf16>, vector<16x16xbf16>, vector<32x16xf32> -> vector<32x16xf32>
    %25 = arith.subf %19, %21 : vector<32x16xf32>
    %26 = arith.subf %24, %19 : vector<32x16xf32>
    %27 = arith.subf %26, %21 : vector<32x16xf32>
    %28 = vector.extract_strided_slice %25 {offsets = [0, 0], sizes = [16, 16], strides = [1, 1]} : vector<32x16xf32> to vector<16x16xf32>
    %29 = vector.extract_strided_slice %27 {offsets = [0, 0], sizes = [16, 16], strides = [1, 1]} : vector<32x16xf32> to vector<16x16xf32>
    %30 = arith.truncf %28 : vector<16x16xf32> to vector<16x16xbf16>
    %cst_29 = arith.constant dense<0.000000e+00> : vector<16x16xf32>
    %31 = tpu.matmul %0, %30, %cst_29 {dimension_numbers = #tpu.dot_dimension_numbers<[1], [0], [0], [1], [0, 0, 1, 1], [], []>} : vector<16x16xbf16>, vector<16x16xbf16>, vector<16x16xf32> -> vector<16x16xf32>
    %32 = arith.truncf %29 : vector<16x16xf32> to vector<16x16xbf16>
    %cst_30 = arith.constant dense<0.000000e+00> : vector<16x16xf32>
    %33 = tpu.matmul %1, %32, %cst_30 {dimension_numbers = #tpu.dot_dimension_numbers<[1], [0], [0], [1], [0, 0, 1, 1], [], []>} : vector<16x16xbf16>, vector<16x16xbf16>, vector<16x16xf32> -> vector<16x16xf32>
    %34 = arith.addf %28, %29 : vector<16x16xf32>
    %35 = arith.truncf %34 : vector<16x16xf32> to vector<16x16xbf16>
    %cst_31 = arith.constant dense<0.000000e+00> : vector<16x16xf32>
    %36 = tpu.matmul %2, %35, %cst_31 {dimension_numbers = #tpu.dot_dimension_numbers<[1], [0], [0], [1], [0, 0, 1, 1], [], []>} : vector<16x16xbf16>, vector<16x16xbf16>, vector<16x16xf32> -> vector<16x16xf32>
    %37 = arith.subf %31, %33 : vector<16x16xf32>
    %38 = arith.subf %36, %31 : vector<16x16xf32>
    %39 = arith.subf %38, %33 : vector<16x16xf32>
    %40 = arith.mulf %37, %10 : vector<16x16xf32>
    %41 = arith.mulf %39, %13 : vector<16x16xf32>
    %42 = arith.subf %40, %41 : vector<16x16xf32>
    %43 = arith.mulf %37, %13 : vector<16x16xf32>
    %44 = arith.mulf %39, %10 : vector<16x16xf32>
    %45 = arith.addf %43, %44 : vector<16x16xf32>
    %46 = arith.truncf %42 : vector<16x16xf32> to vector<16x16xbf16>
    %cst_32 = arith.constant dense<0.000000e+00> : vector<16x16xf32>
    %47 = tpu.matmul %0, %46, %cst_32 {dimension_numbers = #tpu.dot_dimension_numbers<[1], [0], [0], [1], [0, 0, 1, 1], [], []>} : vector<16x16xbf16>, vector<16x16xbf16>, vector<16x16xf32> -> vector<16x16xf32>
    %48 = arith.truncf %45 : vector<16x16xf32> to vector<16x16xbf16>
    %cst_33 = arith.constant dense<0.000000e+00> : vector<16x16xf32>
    %49 = tpu.matmul %1, %48, %cst_33 {dimension_numbers = #tpu.dot_dimension_numbers<[1], [0], [0], [1], [0, 0, 1, 1], [], []>} : vector<16x16xbf16>, vector<16x16xbf16>, vector<16x16xf32> -> vector<16x16xf32>
    %50 = arith.addf %42, %45 : vector<16x16xf32>
    %51 = arith.truncf %50 : vector<16x16xf32> to vector<16x16xbf16>
    %cst_34 = arith.constant dense<0.000000e+00> : vector<16x16xf32>
    %52 = tpu.matmul %3, %51, %cst_34 {dimension_numbers = #tpu.dot_dimension_numbers<[1], [0], [0], [1], [0, 0, 1, 1], [], []>} : vector<16x16xbf16>, vector<16x16xbf16>, vector<16x16xf32> -> vector<16x16xf32>
    %53 = arith.addf %47, %49 : vector<16x16xf32>
    %54 = arith.subf %52, %47 : vector<16x16xf32>
    %55 = arith.addf %54, %49 : vector<16x16xf32>
    %c0_35 = arith.constant 0 : index
    %c0_36 = arith.constant 0 : index
    %56 = vector.load %arg16[%c0_35, %c0_36] : memref<32x16xf32, #tpu.memory_space<vmem>>, vector<16x16xf32>
    tpu.vector_store %arg16[%c0_35, %c0_36], %53 {strides = array<i32>} : memref<32x16xf32, #tpu.memory_space<vmem>>, vector<16x16xf32>,
    %c0_37 = arith.constant 0 : index
    %c0_38 = arith.constant 0 : index
    %57 = vector.load %arg17[%c0_37, %c0_38] : memref<32x16xf32, #tpu.memory_space<vmem>>, vector<16x16xf32>
    tpu.vector_store %arg17[%c0_37, %c0_38], %55 {strides = array<i32>} : memref<32x16xf32, #tpu.memory_space<vmem>>, vector<16x16xf32>,
    %58 = vector.extract_strided_slice %25 {offsets = [16, 0], sizes = [16, 16], strides = [1, 1]} : vector<32x16xf32> to vector<16x16xf32>
    %59 = vector.extract_strided_slice %27 {offsets = [16, 0], sizes = [16, 16], strides = [1, 1]} : vector<32x16xf32> to vector<16x16xf32>
    %60 = arith.truncf %58 : vector<16x16xf32> to vector<16x16xbf16>
    %cst_39 = arith.constant dense<0.000000e+00> : vector<16x16xf32>
    %61 = tpu.matmul %0, %60, %cst_39 {dimension_numbers = #tpu.dot_dimension_numbers<[1], [0], [0], [1], [0, 0, 1, 1], [], []>} : vector<16x16xbf16>, vector<16x16xbf16>, vector<16x16xf32> -> vector<16x16xf32>
    %62 = arith.truncf %59 : vector<16x16xf32> to vector<16x16xbf16>
    %cst_40 = arith.constant dense<0.000000e+00> : vector<16x16xf32>
    %63 = tpu.matmul %1, %62, %cst_40 {dimension_numbers = #tpu.dot_dimension_numbers<[1], [0], [0], [1], [0, 0, 1, 1], [], []>} : vector<16x16xbf16>, vector<16x16xbf16>, vector<16x16xf32> -> vector<16x16xf32>
    %64 = arith.addf %58, %59 : vector<16x16xf32>
    %65 = arith.truncf %64 : vector<16x16xf32> to vector<16x16xbf16>
    %cst_41 = arith.constant dense<0.000000e+00> : vector<16x16xf32>
    %66 = tpu.matmul %2, %65, %cst_41 {dimension_numbers = #tpu.dot_dimension_numbers<[1], [0], [0], [1], [0, 0, 1, 1], [], []>} : vector<16x16xbf16>, vector<16x16xbf16>, vector<16x16xf32> -> vector<16x16xf32>
    %67 = arith.subf %61, %63 : vector<16x16xf32>
    %68 = arith.subf %66, %61 : vector<16x16xf32>
    %69 = arith.subf %68, %63 : vector<16x16xf32>
    %70 = arith.mulf %67, %10 : vector<16x16xf32>
    %71 = arith.mulf %69, %13 : vector<16x16xf32>
    %72 = arith.subf %70, %71 : vector<16x16xf32>
    %73 = arith.mulf %67, %13 : vector<16x16xf32>
    %74 = arith.mulf %69, %10 : vector<16x16xf32>
    %75 = arith.addf %73, %74 : vector<16x16xf32>
    %76 = arith.truncf %72 : vector<16x16xf32> to vector<16x16xbf16>
    %cst_42 = arith.constant dense<0.000000e+00> : vector<16x16xf32>
    %77 = tpu.matmul %0, %76, %cst_42 {dimension_numbers = #tpu.dot_dimension_numbers<[1], [0], [0], [1], [0, 0, 1, 1], [], []>} : vector<16x16xbf16>, vector<16x16xbf16>, vector<16x16xf32> -> vector<16x16xf32>
    %78 = arith.truncf %75 : vector<16x16xf32> to vector<16x16xbf16>
    %cst_43 = arith.constant dense<0.000000e+00> : vector<16x16xf32>
    %79 = tpu.matmul %1, %78, %cst_43 {dimension_numbers = #tpu.dot_dimension_numbers<[1], [0], [0], [1], [0, 0, 1, 1], [], []>} : vector<16x16xbf16>, vector<16x16xbf16>, vector<16x16xf32> -> vector<16x16xf32>
    %80 = arith.addf %72, %75 : vector<16x16xf32>
    %81 = arith.truncf %80 : vector<16x16xf32> to vector<16x16xbf16>
    %cst_44 = arith.constant dense<0.000000e+00> : vector<16x16xf32>
    %82 = tpu.matmul %3, %81, %cst_44 {dimension_numbers = #tpu.dot_dimension_numbers<[1], [0], [0], [1], [0, 0, 1, 1], [], []>} : vector<16x16xbf16>, vector<16x16xbf16>, vector<16x16xf32> -> vector<16x16xf32>
    %83 = arith.addf %77, %79 : vector<16x16xf32>
    %84 = arith.subf %82, %77 : vector<16x16xf32>
    %85 = arith.addf %84, %79 : vector<16x16xf32>
    %c16 = arith.constant 16 : index
    %c0_45 = arith.constant 0 : index
    %86 = vector.load %arg16[%c16, %c0_45] : memref<32x16xf32, #tpu.memory_space<vmem>>, vector<16x16xf32>
    tpu.vector_store %arg16[%c16, %c0_45], %83 {strides = array<i32>} : memref<32x16xf32, #tpu.memory_space<vmem>>, vector<16x16xf32>,
    %c16_46 = arith.constant 16 : index
    %c0_47 = arith.constant 0 : index
    %87 = vector.load %arg17[%c16_46, %c0_47] : memref<32x16xf32, #tpu.memory_space<vmem>>, vector<16x16xf32>
    tpu.vector_store %arg17[%c16_46, %c0_47], %85 {strides = array<i32>} : memref<32x16xf32, #tpu.memory_space<vmem>>, vector<16x16xf32>,
    %c0_48 = arith.constant 0 : index
    %c0_49 = arith.constant 0 : index
    %88 = vector.load %arg16[%c0_48, %c0_49] : memref<32x16xf32, #tpu.memory_space<vmem>>, vector<32x16xf32>
    %c0_50 = arith.constant 0 : index
    %c0_51 = arith.constant 0 : index
    %89 = vector.load %arg17[%c0_50, %c0_51] : memref<32x16xf32, #tpu.memory_space<vmem>>, vector<32x16xf32>
    %90 = arith.truncf %88 : vector<32x16xf32> to vector<32x16xbf16>
    %cst_52 = arith.constant dense<0.000000e+00> : vector<32x16xf32>
    %91 = tpu.matmul %90, %4, %cst_52 {dimension_numbers = #tpu.dot_dimension_numbers<[1], [0], [0], [1], [0, 0, 1, 1], [], []>} : vector<32x16xbf16>, vector<16x16xbf16>, vector<32x16xf32> -> vector<32x16xf32>
    %92 = arith.truncf %89 : vector<32x16xf32> to vector<32x16xbf16>
    %cst_53 = arith.constant dense<0.000000e+00> : vector<32x16xf32>
    %93 = tpu.matmul %92, %5, %cst_53 {dimension_numbers = #tpu.dot_dimension_numbers<[1], [0], [0], [1], [0, 0, 1, 1], [], []>} : vector<32x16xbf16>, vector<16x16xbf16>, vector<32x16xf32> -> vector<32x16xf32>
    %94 = arith.addf %88, %89 : vector<32x16xf32>
    %95 = arith.truncf %94 : vector<32x16xf32> to vector<32x16xbf16>
    %cst_54 = arith.constant dense<0.000000e+00> : vector<32x16xf32>
    %96 = tpu.matmul %95, %7, %cst_54 {dimension_numbers = #tpu.dot_dimension_numbers<[1], [0], [0], [1], [0, 0, 1, 1], [], []>} : vector<32x16xbf16>, vector<16x16xbf16>, vector<32x16xf32> -> vector<32x16xf32>
    %97 = arith.addf %91, %93 : vector<32x16xf32>
    %98 = arith.subf %96, %91 : vector<32x16xf32>
    %99 = arith.addf %98, %93 : vector<32x16xf32>
    %cst_55 = arith.constant 3.906250e-03 : f32
    %100 = vector.broadcast %cst_55 : f32 to vector<32x16xf32>
    %101 = arith.mulf %97, %100 : vector<32x16xf32>
    %102 = vector.shape_cast %101 : vector<32x16xf32> to vector<2x1x16x16xf32>
    %c0_56 = arith.constant 0 : index
    %c0_57 = arith.constant 0 : index
    %c0_58 = arith.constant 0 : index
    %c0_59 = arith.constant 0 : index
    %103 = vector.load %arg14[%c0_56, %c0_57, %c0_58, %c0_59] : memref<2x1x16x16xf32, #tpu.memory_space<vmem>>, vector<2x1x16x16xf32>
    tpu.vector_store %arg14[%c0_56, %c0_57, %c0_58, %c0_59], %102 {strides = array<i32>} : memref<2x1x16x16xf32, #tpu.memory_space<vmem>>, vector<2x1x16x16xf32>,
    %cst_60 = arith.constant 3.906250e-03 : f32
    %104 = vector.broadcast %cst_60 : f32 to vector<32x16xf32>
    %105 = arith.mulf %99, %104 : vector<32x16xf32>
    %106 = vector.shape_cast %105 : vector<32x16xf32> to vector<2x1x16x16xf32>
    %c0_61 = arith.constant 0 : index
    %c0_62 = arith.constant 0 : index
    %c0_63 = arith.constant 0 : index
    %c0_64 = arith.constant 0 : index
    %107 = vector.load %arg15[%c0_61, %c0_62, %c0_63, %c0_64] : memref<2x1x16x16xf32, #tpu.memory_space<vmem>>, vector<2x1x16x16xf32>
    tpu.vector_store %arg15[%c0_61, %c0_62, %c0_63, %c0_64], %106 {strides = array<i32>} : memref<2x1x16x16xf32, #tpu.memory_space<vmem>>, vector<2x1x16x16xf32>,
    return
  }
  func.func @transform_0(%arg0: i32, %arg1: i32) -> (i32, i32) {
    %c0_i32 = arith.constant 0 : i32
    %c0_i32_0 = arith.constant 0 : i32
    %c0_i32_1 = arith.constant 0 : i32
    return %c0_i32, %c0_i32_0 : i32, i32
  }
  func.func @transform_1(%arg0: i32, %arg1: i32) -> (i32, i32) {
    %c0_i32 = arith.constant 0 : i32
    %c0_i32_0 = arith.constant 0 : i32
    %c0_i32_1 = arith.constant 0 : i32
    return %c0_i32, %c0_i32_0 : i32, i32
  }
  func.func @transform_2(%arg0: i32, %arg1: i32) -> (i32, i32) {
    %c0_i32 = arith.constant 0 : i32
    %c0_i32_0 = arith.constant 0 : i32
    %c0_i32_1 = arith.constant 0 : i32
    return %c0_i32, %c0_i32_0 : i32, i32
  }
  func.func @transform_3(%arg0: i32, %arg1: i32) -> (i32, i32) {
    %c0_i32 = arith.constant 0 : i32
    %c0_i32_0 = arith.constant 0 : i32
    %c0_i32_1 = arith.constant 0 : i32
    return %c0_i32, %c0_i32_0 : i32, i32
  }
  func.func @transform_4(%arg0: i32, %arg1: i32) -> (i32, i32) {
    %c0_i32 = arith.constant 0 : i32
    %c0_i32_0 = arith.constant 0 : i32
    %c0_i32_1 = arith.constant 0 : i32
    return %c0_i32, %c0_i32_0 : i32, i32
  }
  func.func @transform_5(%arg0: i32, %arg1: i32) -> (i32, i32) {
    %c0_i32 = arith.constant 0 : i32
    %c0_i32_0 = arith.constant 0 : i32
    %c0_i32_1 = arith.constant 0 : i32
    return %c0_i32, %c0_i32_0 : i32, i32
  }
  func.func @transform_6(%arg0: i32, %arg1: i32) -> (i32, i32) {
    %c0_i32 = arith.constant 0 : i32
    %c0_i32_0 = arith.constant 0 : i32
    %c0_i32_1 = arith.constant 0 : i32
    return %c0_i32, %c0_i32_0 : i32, i32
  }
  func.func @transform_7(%arg0: i32, %arg1: i32) -> (i32, i32) {
    %c0_i32 = arith.constant 0 : i32
    %c0_i32_0 = arith.constant 0 : i32
    %c0_i32_1 = arith.constant 0 : i32
    return %c0_i32, %c0_i32_0 : i32, i32
  }
  func.func @transform_8(%arg0: i32, %arg1: i32) -> (i32, i32, i32) {
    %c0_i32 = arith.constant 0 : i32
    %c0_i32_0 = arith.constant 0 : i32
    %c0_i32_1 = arith.constant 0 : i32
    %c0_i32_2 = arith.constant 0 : i32
    return %c0_i32, %c0_i32_0, %c0_i32_1 : i32, i32, i32
  }
  func.func @transform_9(%arg0: i32, %arg1: i32) -> (i32, i32, i32) {
    %c0_i32 = arith.constant 0 : i32
    %c0_i32_0 = arith.constant 0 : i32
    %c0_i32_1 = arith.constant 0 : i32
    %c0_i32_2 = arith.constant 0 : i32
    return %c0_i32, %c0_i32_0, %c0_i32_1 : i32, i32, i32
  }
  func.func @transform_10(%arg0: i32, %arg1: i32) -> (i32, i32, i32, i32) {
    %c0_i32 = arith.constant 0 : i32
    %c0_i32_0 = arith.constant 0 : i32
    %c0_i32_1 = arith.constant 0 : i32
    return %arg1, %arg0, %c0_i32, %c0_i32_0 : i32, i32, i32, i32
  }
  func.func @transform_11(%arg0: i32, %arg1: i32) -> (i32, i32, i32, i32) {
    %c0_i32 = arith.constant 0 : i32
    %c0_i32_0 = arith.constant 0 : i32
    %c0_i32_1 = arith.constant 0 : i32
    return %arg1, %arg0, %c0_i32, %c0_i32_0 : i32, i32, i32, i32
  }
  func.func @transform_12(%arg0: i32, %arg1: i32) -> (i32, i32, i32, i32) {
    %c0_i32 = arith.constant 0 : i32
    %c0_i32_0 = arith.constant 0 : i32
    %c0_i32_1 = arith.constant 0 : i32
    return %arg1, %arg0, %c0_i32, %c0_i32_0 : i32, i32, i32, i32
  }
  func.func @transform_13(%arg0: i32, %arg1: i32) -> (i32, i32, i32, i32) {
    %c0_i32 = arith.constant 0 : i32
    %c0_i32_0 = arith.constant 0 : i32
    %c0_i32_1 = arith.constant 0 : i32
    return %arg1, %arg0, %c0_i32, %c0_i32_0 : i32, i32, i32, i32
  }
}

</mosaic_0001>

<bundles_post_ra>
// kernel: tpu_custom_call.1
= control target key start
LH: loop header
LB: loop body
LE: loop exit
PB: predicated region body
PF: predicated region fallthrough
CT: control target
= control target key end

     0   :  { %s3491_s0 = inlined_call_operand.hbm [shape: bf16[16,16], index: 0, kind: input, shape index: {}]   ;;  %s3492_s1 = inlined_call_operand.hbm [shape: bf16[16,16], index: 1, kind: input, shape index: {}]   ;;  %s3493_s2 = inlined_call_operand.hbm [shape: bf16[16,16], index: 2, kind: input, shape index: {}]   ;;  %s3494_s3 = inlined_call_operand.hbm [shape: bf16[16,16], index: 3, kind: input, shape index: {}]   ;;  %s3495_s4 = inlined_call_operand.hbm [shape: bf16[16,16], index: 4, kind: input, shape index: {}]   ;;  %s3496_s5 = inlined_call_operand.vmem [shape: bf16[16,16], index: 5, kind: input, shape index: {}]   ;;  %s3497_s6 = inlined_call_operand.hbm [shape: bf16[16,16], index: 6, kind: input, shape index: {}]   ;;  %s3498_s7 = inlined_call_operand.hbm [shape: bf16[16,16], index: 7, kind: input, shape index: {}]   ;;  %s3499_s8 = inlined_call_operand.hbm [shape: f32[6,16,16], index: 8, kind: input, shape index: {}]   ;;  %s3500_s9 = inlined_call_operand.hbm [shape: f32[6,16,16], index: 9, kind: input, shape index: {}]   ;;  %s3501_s10 = inlined_call_operand.hbm [shape: f32[2,6,16,16], index: 10, kind: input, shape index: {}]   ;;  %s3502_s11 = inlined_call_operand.hbm [shape: f32[2,6,16,16], index: 11, kind: input, shape index: {}]   ;;  %s3503_s12 = inlined_call_operand.hbm [shape: f32[2,6,16,16], index: 12, kind: output, shape index: {0}]   ;;  %s3504_s13 = inlined_call_operand.hbm [shape: f32[2,6,16,16], index: 13, kind: output, shape index: {1}]  }
   0x1   :  { %3517 = sst [smem:[#allocation49_spill]] %s3491_s0 }
   0x2   :  { %3518 = sst [smem:[#allocation50_spill]] %s3492_s1 }
   0x3   :  { %3519 = sst [smem:[#allocation51_spill]] %s3493_s2 }
   0x4   :  { %3520 = sst [smem:[#allocation52_spill]] %s3494_s3 }
   0x5   :  { %3521 = sst [smem:[#allocation53_spill]] %s3503_s12 }
   0x6   :  { %3522 = sst [smem:[#allocation54_spill]] %s3504_s13 }
   0x7   :  { %19 = vsyncpa [#allocation5], 0 }
   0x8   :  { %20 = vsyncpa [#allocation8], 0 }
   0x9   :  { %21 = vsyncpa [#allocation11], 0 }
   0xa   :  { %22 = vsyncpa [#allocation14], 0 }
   0xb   :  { %23 = vsyncpa [#allocation17], 0 }
   0xc   :  { %24 = vsyncpa [#allocation20], 0 }
   0xd   :  { %26 = vsyncpa [#allocation20 + $0x1], 0 }
   0xe   :  { %27 = vsyncpa [#allocation6], 0 }
   0xf   :  { %29 = vsyncpa [#allocation6 + $0x1], 0 }
  0x10   :  { %30 = vsyncpa [#allocation24], 0 }
  0x11   :  { %32 = vsyncpa [#allocation24 + $0x1], 0  ;;  %s2975_s25 = smov 0   ;;  %s2977_s26 = smov 0  }
  0x12   :  { %s2979_s27 = smov 0   ;;  %s2981_s28 = smov 0  }
  0x13   :  { %s2983_s29 = smov 0   ;;  %s2985_s30 = smov 0  }
  0x14 LB: > { %3523 = sst [smem:[#allocation43_spill]] %s2842_s25  ;;  %s3006_s14 = sadd.s32 4294967295, %s2862_s30   ;;  %s2862_s30 = sphi %s2985_s30, %s38_s30   ;;  %s2858_s29 = sphi %s2983_s29, %s3567_s29   ;;  %s2854_s28 = sphi %s2981_s28, %s3566_s28   ;;  %s2850_s27 = sphi %s2979_s27, %s3565_s27   ;;  %s2846_s26 = sphi %s2977_s26, %s3564_s26   ;;  %s2842_s25 = sphi %s2975_s25, %s3563_s25  }
  0x15   : > { %3524 = sst [smem:[#allocation44_spill]] %s2854_s28  ;;  %s2098_s15 = sadd.s32 4294967294, %s2862_s30  }
  0x16   : > { %s50_s16 = sadd.s32 1, %s2858_s29  ;;  %s269_s17 = sadd.s32 1, %s2850_s27 }
  0x17   : > { %p52_p0 = scmp.ge.s32.totalorder %s50_s16, 6  ;;  %p276_p1 = scmp.ne.s32.totalorder %s2850_s27, %s2846_s26 }
  0x18   : > { %p277_p2 = scmp.eq.s32.totalorder %s2862_s30, 0  ;;  %p282_p3 = scmp.ne.s32.totalorder %s2846_s26, %s2842_s25 }
  0x19   : > { %s3569_s16 = smov (%p52_p0, %s50_s16), 0  ;;  %p3508_p5 = scmp.eq.s32.totalorder %s3006_s14, 0 }
  0x1a   : > { %3525 = sst [smem:[#allocation45_spill]] %s3569_s16  ;;  %p3018_p4 = por %p277_p2, %p276_p1 }
  0x1b   : > { %s265_s19 = ssub.s32 %s2858_s29, %s3569_s16  ;;  %p336_p6 = scmp.eq.s32.totalorder %s3006_s14, 5 }
  0x1c   : > { %p267_p7 = scmp.eq.s32.totalorder %s265_s19, 0  ;;  %p3028_p8 = por %p3508_p5, %p282_p3 }
  0x1d   : > { %p3032_p9 = por %p336_p6, %p276_p1  ;;  %p342_p10 = scmp.eq.s32.totalorder %s2098_s15, 5 }
  0x1e   : > { %s3037_s22 = scalar_select %p267_p7, %s2850_s27, %s269_s17  }
  0x1f   : > { %s3528_s21 = scalar_select %p3032_p9, 1, 0 }
  0x20   : > { %3530 = sst [smem:[#allocation47_spill]] %s3037_s22  ;;  %p3039_p11 = por %p342_p10, %p282_p3 }
  0x21   : > { %3529 = sst [smem:[#allocation46_spill]] %s3528_s21  ;;  %p2099_p12 = scmp.ge.s32.totalorder %s2862_s30, 1 }
  0x22   : > { %s3531_s23 = scalar_select %p3039_p11, 1, 0 }
  0x23   : > { %p377_p13 = scmp.lt.s32.totalorder %s2862_s30, 7  ;;  %s2864_s19 = smov [#allocation7]  }
  0x24   : > { %3532 = sst [smem:[#allocation48_spill]] %s3531_s23  ;;  %s402_s16 = sshll.u32 %s2864_s19, 4  ;;  %s403_s16 = int_to_ptr.vmem [resolvable:$true] %s402_s16 }
  0x25   : > { %p3045_p0 = pnand %p2099_p12, %p377_p13  ;;  %s2865_s25 = smov [#allocation10]  }
  0x26   : > { %s428_s15 = sshll.u32 %s2865_s25, 4  ;;  %s2866_s22 = smov [#allocation13]   ;;  %s3057_s15 = int_to_ptr.vmem [resolvable:$true] %s428_s15 }
  0x27   : > { %p2399_p1 = pneg %p3045_p0  ;;  %s457_s23 = sshll.u32 %s2866_s22, 4  ;;  %s3059_s23 = int_to_ptr.vmem [resolvable:$true] %s457_s23 }
  0x28   : > { %s2561_s13 = scalar_lea.vmem %s403_s16, 128  ;;  %p2569_p12 = scmp.lt.s32.totalorder %s403_s16, %s403_s16 }
  0x29   : > { %p3053_p2 = pnand %p2399_p1, %p3508_p5  ;;  %p2562_p6 = scmp.ne.s32.totalorder %s403_s16, %s2561_s13 }
  0x2a   : > { %p2570_p13 = scmp.lt.s32.totalorder %s2561_s13, %s2561_s13 }
  0x2b   : > { %p3063_p3 = pneg %p3053_p2 }
  0x2c   : > { %p2571_p1 = por %p2570_p13, %p2569_p12 }
  0x2d   : > { %p2564_p7 = pnand %p2562_p6, %p3063_p3 }
  0x2f   : > { %p2565_p10 = pneg %p2564_p7 }
  0x31   : > { %p2572_p5 = pnand %p2571_p1, %p2565_p10 }
  0x33   : > { %2575 = shalt.err (!%p2572_p5)
}
  0x34   : > { %s3512_s25 = smov 64   ;;  %s2868_s22 = smov 4  }
  0x35   : > { %s3536_s1 = sld [smem:[#allocation50_spill]]  ;;  %s2587_s28 = scalar_lea.vmem %s3057_s15, 128 }
  0x36   : > { %p2588_p6 = scmp.ne.s32.totalorder %s3057_s15, %s2587_s28  ;;  %p2595_p10 = scmp.lt.s32.totalorder %s3057_s15, %s3057_s15 }
  0x37   : > { %p2596_p12 = scmp.lt.s32.totalorder %s2587_s28, %s2587_s28 }
  0x38   : > { %p2590_p7 = pnand %p2588_p6, %p3063_p3 }
  0x39   : > { %p2597_p13 = por %p2596_p12, %p2595_p10 }
  0x3a   : > { %p2591_p5 = pneg %p2590_p7 }
  0x3b   : > { %2405 = dma.hbm_to_vmem [thread:$0]  (!%p3053_p2), %s3536_s1, 128, %s403_s16, [#allocation8], %s3512_s25, %s3512_s25, %s2868_s22  }
  0x3c   : > { %p2598_p1 = pnand %p2597_p13, %p2591_p5 }
  0x3e   : > { %2601 = shalt.err (!%p2598_p1)
}
  0x3f   : > { %s3537_s3 = sld [smem:[#allocation52_spill]]  ;;  %s2613_s16 = scalar_lea.vmem %s3059_s23, 128 }
  0x40   : > { %p2614_p6 = scmp.ne.s32.totalorder %s3059_s23, %s2613_s16  ;;  %p2621_p10 = scmp.lt.s32.totalorder %s3059_s23, %s3059_s23 }
  0x41   : > { %p2622_p12 = scmp.lt.s32.totalorder %s2613_s16, %s2613_s16 }
  0x42   : > { %p2616_p7 = pnand %p2614_p6, %p3063_p3 }
  0x43   : > { %p2623_p13 = por %p2622_p12, %p2621_p10 }
  0x44   : > { %p2617_p5 = pneg %p2616_p7 }
  0x45   : > { %2411 = dma.hbm_to_vmem [thread:$0]  (!%p3053_p2), %s3537_s3, 128, %s3057_s15, [#allocation11], %s3512_s25, %s3512_s25, %s2868_s22  }
  0x46   : > { %p2624_p1 = pnand %p2623_p13, %p2617_p5 }
  0x48   : > { %2627 = shalt.err (!%p2624_p1)
}
  0x49   : > { %2417 = dma.hbm_to_vmem [thread:$0]  (!%p3053_p2), %s3497_s6, 128, %s3059_s23, [#allocation14], %s3512_s25, %s3512_s25, %s2868_s22  }
  0x4a   : > { %s2869_s15 = smov [#allocation16]  }
  0x4b   : > { %s483_s13 = sshll.u32 %s2869_s15, 4  ;;  %s484_s13 = int_to_ptr.vmem [resolvable:$true] %s483_s13 }
  0x4c   : > { %s2639_s12 = scalar_lea.vmem %s484_s13, 1536  ;;  %p2647_p10 = scmp.lt.s32.totalorder %s484_s13, %s484_s13 }
  0x4d   : > { %p2640_p6 = scmp.ne.s32.totalorder %s484_s13, %s2639_s12  ;;  %p2648_p12 = scmp.lt.s32.totalorder %s2639_s12, %s2639_s12 }
  0x4f   : > { %p2642_p7 = pnand %p2640_p6, %p3063_p3  ;;  %p2649_p13 = por %p2648_p12, %p2647_p10 }
  0x51   : > { %p2643_p5 = pneg %p2642_p7 }
  0x53   : > { %p2650_p1 = pnand %p2649_p13, %p2643_p5 }
  0x55   : > { %2653 = shalt.err (!%p2650_p1)
}
  0x56   : > { %s3514_s16 = smov 128   ;;  %s3515_s1 = smov 8  }
  0x57   : > { %2423 = dma.hbm_to_vmem [thread:$0]  (!%p3053_p2), %s3499_s8, 1536, %s484_s13, [#allocation17], %s3514_s16, %s3514_s16, %s3515_s1  }
  0x58   : > { %s2872_s21 = smov [#allocation4]  }
  0x59   : > { %s389_s15 = sshll.u32 %s2872_s21, 4  ;;  %s390_s15 = int_to_ptr.vmem [resolvable:$true] %s389_s15 }
  0x5a   : > { %s2665_s25 = scalar_lea.vmem %s390_s15, 128  ;;  %p2673_p10 = scmp.lt.s32.totalorder %s390_s15, %s390_s15 }
  0x5b   : > { %p2666_p6 = scmp.ne.s32.totalorder %s390_s15, %s2665_s25  ;;  %p2674_p12 = scmp.lt.s32.totalorder %s2665_s25, %s2665_s25 }
  0x5d   : > { %p2668_p7 = pnand %p2666_p6, %p3063_p3  ;;  %p2675_p13 = por %p2674_p12, %p2673_p10 }
  0x5f   : > { %p2669_p5 = pneg %p2668_p7 }
  0x61   : > { %p2676_p1 = pnand %p2675_p13, %p2669_p5 }
  0x63   : > { %2679 = shalt.err (!%p2676_p1)
}
  0x64   : > { %s3538_s12 = smov 64   ;;  %s3539_s0 = sld [smem:[#allocation49_spill]] }
  0x65   : > { %s2873_s28 = smov [#allocation9]   ;;  %s2874_s16 = smov [#allocation12]  }
  0x66   : > { %s415_s21 = sshll.u32 %s2873_s28, 4  ;;  %s441_s1 = sshll.u32 %s2874_s16, 4  ;;  %s416_s21 = int_to_ptr.vmem [resolvable:$true] %s415_s21  ;;  %s442_s1 = int_to_ptr.vmem [resolvable:$true] %s441_s1 }
  0x67   : > { %s2691_s3 = scalar_lea.vmem %s416_s21, 128  ;;  %p2699_p10 = scmp.lt.s32.totalorder %s416_s21, %s416_s21 }
  0x68   : > { %p2692_p6 = scmp.ne.s32.totalorder %s416_s21, %s2691_s3  ;;  %p2700_p12 = scmp.lt.s32.totalorder %s2691_s3, %s2691_s3 }
  0x6a   : > { %2402 = dma.hbm_to_vmem [thread:$0]  (!%p3053_p2), %s3539_s0, 128, %s390_s15, [#allocation5], %s3538_s12, %s3538_s12, %s2868_s22  }
  0x6b   : > { %p2694_p7 = pnand %p2692_p6, %p3063_p3  ;;  %p2701_p13 = por %p2700_p12, %p2699_p10 }
  0x6d   : > { %p2695_p5 = pneg %p2694_p7 }
  0x6f   : > { %p2702_p1 = pnand %p2701_p13, %p2695_p5 }
  0x71   : > { %2705 = shalt.err (!%p2702_p1)
}
  0x72   : > { %s3540_s2 = sld [smem:[#allocation51_spill]]  ;;  %s2717_s16 = scalar_lea.vmem %s442_s1, 128 }
  0x73   : > { %p2718_p11 = scmp.ne.s32.totalorder %s442_s1, %s2717_s16  ;;  %p2725_p9 = scmp.lt.s32.totalorder %s442_s1, %s442_s1 }
  0x74   : > { %p2726_p10 = scmp.lt.s32.totalorder %s2717_s16, %s2717_s16 }
  0x75   : > { %p2720_p6 = pnand %p2718_p11, %p3063_p3 }
  0x76   : > { %p2727_p5 = por %p2726_p10, %p2725_p9 }
  0x77   : > { %p2721_p7 = pneg %p2720_p6 }
  0x78   : > { %2408 = dma.hbm_to_vmem [thread:$0]  (!%p3053_p2), %s3540_s2, 128, %s416_s21, [#allocation8], %s3538_s12, %s3538_s12, %s2868_s22  }
  0x79   : > { %p2728_p12 = pnand %p2727_p5, %p2721_p7 }
  0x7b   : > { %2731 = shalt.err (!%p2728_p12)
}
  0x7c   : > { %2414 = dma.hbm_to_vmem [thread:$0]  (!%p3053_p2), %s3495_s4, 128, %s442_s1, [#allocation11], %s3538_s12, %s3538_s12, %s2868_s22  }
  0x7d   : > { %s2875_s13 = smov [#allocation15]   ;;  %s2876_s21 = smov [#allocation18]  }
  0x7e   : > { %s470_s28 = sshll.u32 %s2875_s13, 4  ;;  %s496_s25 = sshll.u32 %s2876_s21, 4  ;;  %s471_s28 = int_to_ptr.vmem [resolvable:$true] %s470_s28  ;;  %s497_s25 = int_to_ptr.vmem [resolvable:$true] %s496_s25 }
  0x7f   : > { %s2743_s15 = scalar_lea.vmem %s471_s28, 128  ;;  %p2751_p1 = scmp.lt.s32.totalorder %s471_s28, %s471_s28 }
  0x80   : > { %p2744_p11 = scmp.ne.s32.totalorder %s471_s28, %s2743_s15  ;;  %p2752_p6 = scmp.lt.s32.totalorder %s2743_s15, %s2743_s15 }
  0x82   : > { %p2746_p9 = pnand %p2744_p11, %p3063_p3  ;;  %p2753_p7 = por %p2752_p6, %p2751_p1 }
  0x84   : > { %p2747_p13 = pneg %p2746_p9 }
  0x86   : > { %p2754_p10 = pnand %p2753_p7, %p2747_p13 }
  0x88   : > { %2757 = shalt.err (!%p2754_p10)
}
  0x89   : > { %2420 = dma.hbm_to_vmem [thread:$0]  (!%p3053_p2), %s3498_s7, 128, %s471_s28, [#allocation14], %s3538_s12, %s3538_s12, %s2868_s22  }
  0x8a   : > { %s2769_s3 = scalar_lea.vmem %s497_s25, 1536  ;;  %p2777_p9 = scmp.lt.s32.totalorder %s497_s25, %s497_s25 }
  0x8b   : > { %p2770_p5 = scmp.ne.s32.totalorder %s497_s25, %s2769_s3  ;;  %p2778_p1 = scmp.lt.s32.totalorder %s2769_s3, %s2769_s3 }
  0x8d   : > { %p2772_p12 = pnand %p2770_p5, %p3063_p3  ;;  %p2779_p13 = por %p2778_p1, %p2777_p9 }
  0x8f   : > { %p2773_p11 = pneg %p2772_p12 }
  0x91   : > { %p2780_p6 = pnand %p2779_p13, %p2773_p11 }
  0x93   : > { %2783 = shalt.err (!%p2780_p6)
}
  0x94   : > { %s3541_s23 = smov 8   ;;  %s3542_s13 = smov 128  }
  0x95   : > { %2426 = dma.hbm_to_vmem [thread:$0]  (!%p3053_p2), %s3500_s9, 1536, %s497_s25, [#allocation17], %s3542_s13, %s3542_s13, %s3541_s23  }
  0x96   : > { %p2109_p7 = scmp.ge.s32.totalorder %s2862_s30, 6 }
  0x98   : > { %506 = sbr.rel (%p2109_p7) target bundleno = 183 (0xb7), region = 56 }
  0x9d   : > { %s510_s19 = sand.u32 1, %s2862_s30   ;;  %s512_s22 = sand.u32 1, %s2850_s27  }
  0x9e   : > { %s2110_s17 = sshll.u32 %s512_s22, 5  ;;  %s2175_s12 = sshll.u32 %s2858_s29, 8 }
  0x9f   : > { %s523_s25 = scalar_lea.hbm %s3501_s10, %s2175_s12  ;;  %s514_s3 = scalar_lea.vmem [#allocation19], %s2110_s17 }
  0xa0   : > { %s2347_s16 = scalar_select %p3018_p4, [#allocation0], [#allocation33] }
  0xa1   : > { %s536_s23 = sshll.u32 %s514_s3, 4  ;;  %s2877_s21 = smov 1536   ;;  %s537_s23 = int_to_ptr.vmem [resolvable:$true] %s536_s23 }
  0xa2   : > { %s528_s13 = sld [smem:[%s2347_s16]]   ;;  %s2878_s15 = smov 256  }
  0xa3   : > { %2348 = sst [smem:[#allocation26]] (%p3018_p4), %s2877_s21  ;;  %s2879_s22 = smov 2  }
  0xa4   : > { %2349 = sst [smem:[#allocation26 + $0x1]] (%p3018_p4), %s2878_s15  ;;  %s2880_s0 = smov 128  }
  0xa5   : > { %2350 = sst [smem:[#allocation26 + $0x2]] (%p3018_p4), %s2879_s22  ;;  %s2881_s1 = smov 8  }
  0xa6   : > { %2351 = sst [smem:[#allocation26 + $0x3]] (%p3018_p4), %s2880_s0  ;;  %s511_s3 = scalar_lea.sflag [#allocation20], %s510_s19 }
  0xa7   : > { %2352 = sst [smem:[#allocation26 + $0x4]] (%p3018_p4), %s2880_s0  ;;  %s2882_s2 = smov 131072  }
  0xa8   : > { %s2113_s28 = sshll.u32 %s528_s13, 26  ;;  %2353 = sst [smem:[#allocation26 + $0x5]] (%p3018_p4), %s2881_s1 }
  0xa9   : > { %s2114_s16 = sadd.s32 134217728, %s2113_s28 }
  0xaa   : > { %2354 = dma.general (%p3018_p4), %s523_s25, 512, %s537_s23, %s511_s3, %s2882_s2, [#allocation26], %s2114_s16, 0  }
  0xab   : > { %s572_s22 = scalar_lea.hbm %s3502_s11, %s2175_s12  ;;  %s563_s13 = scalar_lea.vmem [#allocation21], %s2110_s17 }
  0xac   : > { %s2355_s0 = scalar_select %p3018_p4, [#allocation0], [#allocation34] }
  0xad   : > { %s585_s1 = sshll.u32 %s563_s13, 4  ;;  %s2883_s19 = smov 1536   ;;  %s586_s1 = int_to_ptr.vmem [resolvable:$true] %s585_s1 }
  0xae   : > { %s577_s28 = sld [smem:[%s2355_s0]]   ;;  %s2884_s2 = smov 256  }
  0xaf   : > { %2356 = sst [smem:[#allocation28]] (%p3018_p4), %s2883_s19  ;;  %s2885_s25 = smov 2  }
  0xb0   : > { %2357 = sst [smem:[#allocation28 + $0x1]] (%p3018_p4), %s2884_s2  ;;  %s2886_s23 = smov 128  }
  0xb1   : > { %2358 = sst [smem:[#allocation28 + $0x2]] (%p3018_p4), %s2885_s25  ;;  %s2887_s17 = smov 8  }
  0xb2   : > { %2359 = sst [smem:[#allocation28 + $0x3]] (%p3018_p4), %s2886_s23  ;;  %s2888_s21 = smov 131072  }
  0xb3   : > { %2360 = sst [smem:[#allocation28 + $0x4]] (%p3018_p4), %s2886_s23 }
  0xb4   : > { %s2118_s12 = sshll.u32 %s577_s28, 26  ;;  %2361 = sst [smem:[#allocation28 + $0x5]] (%p3018_p4), %s2887_s17 }
  0xb5   : > { %s2119_s16 = sadd.s32 134217728, %s2118_s12 }
  0xb6   : > { %2362 = dma.general (%p3018_p4), %s572_s22, 512, %s586_s1, %s511_s3, %s2888_s21, [#allocation28], %s2119_s16, 0  }
  0xb7 PF: > { %610 = sbr.rel (%p3045_p0) target bundleno = 1316 (0x524), region = 68  ;;  %p3543_p2 = scmp.eq.s32.totalorder (!%p3045_p0), %s3006_s14, 0 }
  0xbc   : > { %2809 = dma.done.wait (%p3543_p2), [#allocation5], 128   ;;  %p3544_p3 = pmov %p3543_p2 }
  0xbd   : > { %p3545_p10 = pmov %p3543_p2 }
  0xbe   : > { %2811 = vsyncadd (%p3544_p3), [#allocation5], 4294967168 }
  0xbf   : > { %2813 = dma.done.wait (%p3545_p10), [#allocation8], 256   ;;  %p3546_p5 = pmov %p3543_p2 }
  0xc0   : > { %p3547_p12 = pmov %p3543_p2 }
  0xc1   : > { %2815 = vsyncadd (%p3546_p5), [#allocation8], 4294967040 }
  0xc2   : > { %2817 = dma.done.wait (%p3547_p12), [#allocation11], 256   ;;  %p3548_p4 = pmov %p3543_p2 }
  0xc3   : > { %p3549_p0 = pmov %p3543_p2 }
  0xc4   : > { %2819 = vsyncadd (%p3548_p4), [#allocation11], 4294967040 }
  0xc5   : > { %2821 = dma.done.wait (%p3549_p0), [#allocation14], 256   ;;  %p3550_p11 = pmov %p3549_p0 }
  0xc6   : > { %p3551_p9 = pmov %p3549_p0 }
  0xc7   : > { %2823 = vsyncadd (%p3550_p11), [#allocation14], 4294967040 }
  0xc8   : > { %2825 = dma.done.wait (%p3551_p9), [#allocation17], 3072   ;;  %p3552_p1 = pmov %p3549_p0 }
  0xc9   : > { %s648_s18 = sand.u32 1, %s3006_s14   ;;  %s3233_s24 = sand.u32 1, %s2846_s26  }
  0xca   : > { %2827 = vsyncadd (%p3552_p1), [#allocation17], 4294964224  ;;  %s3236_s3 = sshll.u32 %s3233_s24, 5  ;;  %s649_s15 = scalar_lea.sflag [#allocation20], %s648_s18 }
  0xcb   : > { %s652_s22 = scalar_lea.vmem [#allocation19], %s3236_s3 }
  0xcc   : > { %2829 = dma.done.wait (%p3028_p8), %s649_s15, 1024  }
  0xcd   : > { %2831 = vsyncadd (%p3028_p8), %s649_s15, 4294966272  ;;  %v3243_v0 = vld [vmem:[#allocation12] sm:$0xff]   ;;  %v742_v2 = vld [vmem:[%s652_s22] sm:$0xff]  ;;  %vm758_vm0 = vcmask 130048   ;;  %s661_s14 = scalar_lea.vmem [#allocation21], %s3236_s3  ;;  %v2889_v21 = vmov 0.0  }
  0xce   : > { %v3248_v1 = vld [vmem:[%s3496_s5] sm:$0xff]   ;;  %2221 = vmatprep.subr.bf16.mxu0 %v3243_v0  ;;  %v746_v4 = vld [vmem:[%s661_s14] sm:$0xff]  ;;  %v744_v8 = vld [vmem:[%s652_s22 + $0x10] sm:$0xff]  ;;  %vm2890_vm1 = vmmov 0   ;;  %s3553_s20 = sld [smem:[#allocation44_spill]]  ;;  %s3407_s2 = scalar_lea.vmem [#allocation22], %s3236_s3 }
  0xcf   : > { %v743_v3 = vld [vmem:[%s652_s22 + $0x8] sm:$0xff]  ;;  %2227 = vmatprep.subr.bf16.mxu1 %v3248_v1  ;;  %2222 = vmatpush3.bf16.msra.mxu0 %v3243_v0  ;;  %v877_v7 = vadd.f32 %v746_v4, %v742_v2  ;;  %v745_v9 = vld [vmem:[%s652_s22 + $0x18] sm:$0xff]  ;;  %v748_v13 = vld [vmem:[%s661_s14 + $0x10] sm:$0xff]  ;;  %s3414_s25 = scalar_lea.vmem [#allocation23], %s3236_s3  ;;  %s1774_s23 = scalar_lea.sflag [#allocation6], %s3233_s24 }
  0xd0   : > { %v750_v5 = vpack.c.bf16 %v743_v3, %v742_v2  ;;  %v747_v6 = vld [vmem:[%s661_s14 + $0x8] sm:$0xff]  ;;  %2228 = vmatpush3.bf16.msra.mxu1 %v3248_v1  ;;  %v751_v12 = vpack.c.bf16 %v745_v9, %v744_v8  ;;  %v749_v14 = vld [vmem:[%s661_s14 + $0x18] sm:$0xff]  ;;  %v2544_v16 = vld [vmem:[#allocation13] sm:$0xff]   ;;  %v879_v18 = vadd.f32 %v748_v13, %v744_v8  ;;  %s1779_s12 = scalar_lea.sflag [#allocation24], %s3233_s24 }
  0xd1   : > { %v814_v10 = vpack.c.bf16 %v747_v6, %v746_v4  ;;  %v878_v11 = vadd.f32 %v747_v6, %v743_v3  ;;  %v815_v15 = vpack.c.bf16 %v749_v14, %v748_v13  ;;  %v880_v19 = vadd.f32 %v749_v14, %v745_v9  ;;  %2233 = vmatprep.subr.bf16.mxu0 %v2544_v16  ;;  %v3275_v41 = vld [vmem:[#allocation4] sm:$0xff]   ;;  %v3296_v56 = vld [vmem:[#allocation7] sm:$0xff]   ;;  %v3298_v58 = vld [vmem:[#allocation9] sm:$0xff]  }
  0xd2   : > { %2223 = vmatprep.mubr.msk.bf16.mxu0 %vm758_vm0, %v750_v5  ;;  %2239 = vmatprep.subr.bf16.mxu1 %v2889_v21 }
  0xd3   : > { %2229 = vmatprep.mubr.msk.bf16.mxu1 %vm758_vm0, %v814_v10  ;;  %v881_v17 = vpack.c.bf16 %v878_v11, %v877_v7  ;;  %2224 = vmatmul.mubr.msk.bf16.vlgmr.msra.gmra.mxu0 %vm758_vm0, %v751_v12  ;;  %v882_v20 = vpack.c.bf16 %v880_v19, %v879_v18 }
  0xd4   : > { %2230 = vmatmul.mubr.msk.bf16.vlgmr.msra.gmra.mxu1 %vm758_vm0, %v815_v15  ;;  %2234 = vmatpush3.bf16.msra.mxu0 %v2544_v16  ;;  %s2134_s1 = sshll.u32 %s3553_s20, 4 }
  0xd5   : > { %2235 = vmatprep.mubr.msk.bf16.mxu0 %vm758_vm0, %v881_v17  ;;  %2245 = vmatprep.subr.bf16.mxu0 %v2889_v21  ;;  %s736_s28 = scalar_lea.vmem [#allocation16], %s2134_s1  ;;  %s739_s19 = scalar_lea.vmem [#allocation18], %s2134_s1 }
  0xd6   : > { %2241 = vmatprep.mubr.msk.bf16.mxu1 %vm2890_vm1, %v2889_v21  ;;  %v3311_v11 = vld [vmem:[%s736_s28] sm:$0xff]  ;;  %v3315_v16 = vld [vmem:[%s736_s28 + $0x8] sm:$0xff] }
  0xd7   : > { %v3313_v12 = vld [vmem:[%s739_s19] sm:$0xff]  ;;  %v3317_v17 = vld [vmem:[%s739_s19 + $0x8] sm:$0xff] }
  0xdb   : > { %2236 = vmatmul.mubr.msk.bf16.vlgmr.msra.gmra.mxu0 %vm758_vm0, %v882_v20 }
  0xdc   : > { %2247 = vmatprep.mubr.msk.bf16.mxu0 %vm2890_vm1, %v2889_v21 }
 0x193   : > { %v2225_v22 = vpop.f32.mrf.mxu0 }
 0x194   : > { %v2231_v23 = vpop.f32.mrf.mxu1 }
 0x195   : > { %v3267_v24 = vsub.f32 %v2225_v22, %v2231_v23  ;;  %v799_v25 = vpop.f32.mrf.mxu0 }
 0x196   : > { %v862_v26 = vpop.f32.mrf.mxu1 }
 0x197   : > { %v2226_v27 = vpop.f32.mrf.mxu0  ;;  %v944_v32 = vsub.f32 %v799_v25, %v862_v26 }
 0x198   : > { %v2232_v28 = vpop.f32.mrf.mxu1 }
 0x199   : > { %v3269_v29 = vsub.f32 %v2226_v27, %v2232_v28  ;;  %v802_v30 = vpop.f32.mrf.mxu0 }
 0x19a   : > { %v865_v31 = vpop.f32.mrf.mxu1 }
 0x19b   : > { %v1272_v33 = vpack.c.bf16 %v3269_v29, %v3267_v24  ;;  %v945_v34 = vsub.f32 %v802_v30, %v865_v31  ;;  %v2237_v35 = vpop.f32.mrf.mxu0 }
 0x19c   : > { %v950_v36 = vsub.f32 %v2237_v35, %v2225_v22 }
 0x19d   : > { %v956_v37 = vpack.c.bf16 %v945_v34, %v944_v32  ;;  %v929_v38 = vpop.f32.mrf.mxu0 }
 0x19e   : > { %v3273_v39 = vsub.f32 %v950_v36, %v2231_v23  ;;  %v948_v40 = vsub.f32 %v929_v38, %v799_v25 }
 0x19f   : > { %2240 = vmatpush3.bf16.msra.mxu1 %v956_v37  ;;  %v2238_v42 = vpop.f32.mrf.mxu0 }
 0x1a0   : > { %v3279_v43 = vadd.f32 %v3273_v39, %v3267_v24  ;;  %v951_v44 = vsub.f32 %v2238_v42, %v2226_v27  ;;  %2251 = vmatprep.subr.bf16.mxu1 %v2889_v21  ;;  %v952_v46 = vsub.f32 %v948_v40, %v862_v26  ;;  %v3342_v42 = vld [vmem:[#allocation10] sm:$0xff]  }
 0x1a1   : > { %v932_v45 = vpop.f32.mrf.mxu0 }
 0x1a2   : > { %v3282_v47 = vsub.f32 %v951_v44, %v2232_v28  ;;  %v949_v48 = vsub.f32 %v932_v45, %v802_v30  ;;  %2242 = vmatmul.mubr.msk.bf16.vlgmr.msra.gmra.mxu1 %vm758_vm0, %v3275_v41  ;;  %v1056_v52 = vadd.f32 %v952_v46, %v944_v32 }
 0x1a3   : > { %2253 = vmatprep.mubr.msk.bf16.mxu1 %vm2890_vm1, %v2889_v21 }
 0x1a4   : > { %v1314_v49 = vpack.c.bf16 %v3282_v47, %v3273_v39  ;;  %v3292_v50 = vadd.f32 %v3282_v47, %v3269_v29  ;;  %v953_v51 = vsub.f32 %v949_v48, %v865_v31 }
 0x1a6   : > { %v1358_v53 = vpack.c.bf16 %v3292_v50, %v3279_v43  ;;  %v1006_v54 = vpack.c.bf16 %v953_v51, %v952_v46  ;;  %v1057_v55 = vadd.f32 %v953_v51, %v945_v34 }
 0x1a8   : > { %v1058_v57 = vpack.c.bf16 %v1057_v55, %v1056_v52  ;;  %2246 = vmatpush3.bf16.msra.mxu0 %v1006_v54 }
 0x1a9   : > { %2257 = vmatprep.subr.bf16.mxu0 %v2889_v21 }
 0x1aa   : > { %2252 = vmatpush3.bf16.msra.mxu1 %v1058_v57 }
 0x1ab   : > { %2248 = vmatmul.mubr.msk.bf16.vlgmr.msra.gmra.mxu0 %vm758_vm0, %v3296_v56  ;;  %2263 = vmatprep.subr.bf16.mxu1 %v2889_v21 }
 0x1ac   : > { %2259 = vmatprep.mubr.msk.bf16.mxu0 %vm2890_vm1, %v2889_v21 }
 0x1ad   : > { %2254 = vmatmul.mubr.msk.bf16.vlgmr.msra.gmra.mxu1 %vm758_vm0, %v3298_v58 }
 0x1ae   : > { %2265 = vmatprep.mubr.msk.bf16.mxu1 %vm2890_vm1, %v2889_v21 }
 0x262   : > { %v999_v59 = vpop.f32.mrf.mxu1 }
 0x264   : > { %v2243_v60 = vpop.f32.mrf.mxu1 }
 0x266   : > { %v1002_v61 = vpop.f32.mrf.mxu1 }
 0x268   : > { %v2244_v62 = vpop.f32.mrf.mxu1 }
 0x26b   : > { %v1049_v63 = vpop.f32.mrf.mxu0 }
 0x26c   : > { %v1108_v10 = vsub.f32 %v999_v59, %v1049_v63 }
 0x26d   : > { %v2249_v2 = vpop.f32.mrf.mxu0  ;;  %v1101_v3 = vpop.f32.mrf.mxu1 }
 0x26e   : > { %v1110_v4 = vsub.f32 %v1101_v3, %v999_v59  ;;  %v1114_v22 = vmul.f32 %v1108_v10, %v3311_v11  ;;  %v1120_v23 = vmul.f32 %v1108_v10, %v3313_v12 }
 0x26f   : > { %v1052_v5 = vpop.f32.mrf.mxu0  ;;  %v2255_v6 = vpop.f32.mrf.mxu1 }
 0x270   : > { %v1112_v7 = vsub.f32 %v1110_v4, %v1049_v63  ;;  %v1109_v13 = vsub.f32 %v1002_v61, %v1052_v5 }
 0x271   : > { %v2250_v8 = vpop.f32.mrf.mxu0  ;;  %v1104_v9 = vpop.f32.mrf.mxu1 }
 0x272   : > { %v1111_v14 = vsub.f32 %v1104_v9, %v1002_v61  ;;  %v1116_v18 = vmul.f32 %v1112_v7, %v3313_v12  ;;  %v1122_v19 = vmul.f32 %v1112_v7, %v3311_v11  ;;  %v1115_v25 = vmul.f32 %v1109_v13, %v3315_v16 }
 0x273   : > { %v2256_v15 = vpop.f32.mrf.mxu1  ;;  %v1121_v26 = vmul.f32 %v1109_v13, %v3317_v17 }
 0x274   : > { %v1113_v20 = vsub.f32 %v1111_v14, %v1052_v5  ;;  %v1118_v30 = vsub.f32 %v1114_v22, %v1116_v18  ;;  %v1124_v31 = vadd.f32 %v1122_v19, %v1120_v23 }
 0x276   : > { %v1117_v27 = vmul.f32 %v1113_v20, %v3317_v17  ;;  %v1123_v28 = vmul.f32 %v1113_v20, %v3315_v16  ;;  %v1210_v38 = vadd.f32 %v1124_v31, %v1118_v30 }
 0x278   : > { %v1119_v32 = vsub.f32 %v1115_v25, %v1117_v27  ;;  %v1125_v34 = vadd.f32 %v1123_v28, %v1121_v26 }
 0x27a   : > { %v1211_v35 = vadd.f32 %v1125_v34, %v1119_v32  ;;  %v1126_v36 = vpack.c.bf16 %v1119_v32, %v1118_v30  ;;  %v1168_v37 = vpack.c.bf16 %v1125_v34, %v1124_v31 }
 0x27c   : > { %2258 = vmatpush3.bf16.msra.mxu0 %v1126_v36  ;;  %2264 = vmatpush3.bf16.msra.mxu1 %v1168_v37  ;;  %v1212_v40 = vpack.c.bf16 %v1211_v35, %v1210_v38 }
 0x27d   : > { %2269 = vmatprep.subr.bf16.mxu0 %v2889_v21  ;;  %2275 = vmatprep.subr.bf16.mxu1 %v2889_v21 }
 0x27f   : > { %2260 = vmatmul.mubr.msk.bf16.vlgmr.msra.gmra.mxu0 %vm758_vm0, %v3275_v41  ;;  %2266 = vmatmul.mubr.msk.bf16.vlgmr.msra.gmra.mxu1 %vm758_vm0, %v3296_v56 }
 0x280   : > { %2270 = vmatpush3.bf16.msra.mxu0 %v1212_v40  ;;  %2276 = vmatpush3.bf16.msra.mxu1 %v1272_v33 }
 0x281   : > { %2271 = vmatprep.mubr.msk.bf16.mxu0 %vm2890_vm1, %v2889_v21  ;;  %2277 = vmatprep.mubr.msk.bf16.mxu1 %vm2890_vm1, %v2889_v21 }
 0x282   : > { %2281 = vmatprep.subr.bf16.mxu0 %v2889_v21  ;;  %2287 = vmatprep.subr.bf16.mxu1 %v2889_v21 }
 0x287   : > { %2272 = vmatmul.mubr.msk.bf16.vlgmr.msra.gmra.mxu0 %vm758_vm0, %v3342_v42  ;;  %2278 = vmatmul.mubr.msk.bf16.vlgmr.msra.gmra.mxu1 %vm758_vm0, %v3275_v41 }
 0x288   : > { %2282 = vmatpush3.bf16.msra.mxu0 %v1314_v49  ;;  %2288 = vmatpush3.bf16.msra.mxu1 %v1358_v53 }
 0x289   : > { %2283 = vmatprep.mubr.msk.bf16.mxu0 %vm2890_vm1, %v2889_v21  ;;  %2289 = vmatprep.mubr.msk.bf16.mxu1 %vm2890_vm1, %v2889_v21 }
 0x28a   : > { %2293 = vmatprep.subr.bf16.mxu0 %v2889_v21  ;;  %2299 = vmatprep.subr.bf16.mxu1 %v2889_v21 }
 0x28f   : > { %2284 = vmatmul.mubr.msk.bf16.vlgmr.msra.gmra.mxu0 %vm758_vm0, %v3296_v56  ;;  %2290 = vmatmul.mubr.msk.bf16.vlgmr.msra.gmra.mxu1 %vm758_vm0, %v3298_v58 }
 0x290   : > { %2295 = vmatprep.mubr.msk.bf16.mxu0 %vm2890_vm1, %v2889_v21  ;;  %2301 = vmatprep.mubr.msk.bf16.mxu1 %vm2890_vm1, %v2889_v21 }
 0x33f   : > { %v1161_v24 = vpop.f32.mrf.mxu0  ;;  %v1203_v29 = vpop.f32.mrf.mxu1 }
 0x340   : > { %v1262_v33 = vadd.f32 %v1203_v29, %v1161_v24 }
 0x341   : > { %v2261_v39 = vpop.f32.mrf.mxu0  ;;  %v2267_v43 = vpop.f32.mrf.mxu1 }
 0x342   : > { %1268 = vst.msk [vmem:[#allocation2] sm:$0xff] %vm758_vm0, %v1262_v33 }
 0x343   : > { %v1164_v44 = vpop.f32.mrf.mxu0  ;;  %v1206_v45 = vpop.f32.mrf.mxu1 }
 0x344   : > { %v1263_v46 = vadd.f32 %v1206_v45, %v1164_v44 }
 0x345   : > { %v2262_v47 = vpop.f32.mrf.mxu0  ;;  %v2268_v48 = vpop.f32.mrf.mxu1 }
 0x346   : > { %1269 = vst.msk [vmem:[#allocation2 + $0x8] sm:$0xff] %vm758_vm0, %v1263_v46 }
 0x347   : > { %v1255_v49 = vpop.f32.mrf.mxu0  ;;  %v1307_v50 = vpop.f32.mrf.mxu1 }
 0x348   : > { %v1264_v51 = vsub.f32 %v1255_v49, %v1161_v24 }
 0x349   : > { %v2273_v52 = vpop.f32.mrf.mxu0  ;;  %v2279_v53 = vpop.f32.mrf.mxu1  ;;  %v1556_v13 = vld [vmem:[#allocation2] sm:$0xff] }
 0x34a   : > { %v1266_v54 = vadd.f32 %v1264_v51, %v1203_v29 }
 0x34b   : > { %v1258_v55 = vpop.f32.mrf.mxu0  ;;  %v1310_v57 = vpop.f32.mrf.mxu1 }
 0x34c   : > { %1270 = vst.msk [vmem:[#allocation3] sm:$0xff] %vm758_vm0, %v1266_v54  ;;  %v1265_v58 = vsub.f32 %v1258_v55, %v1164_v44 }
 0x34d   : > { %v2274_v59 = vpop.f32.mrf.mxu0  ;;  %v2280_v60 = vpop.f32.mrf.mxu1  ;;  %v1557_v25 = vld [vmem:[#allocation2 + $0x8] sm:$0xff] }
 0x34e   : > { %v1267_v61 = vadd.f32 %v1265_v58, %v1206_v45 }
 0x34f   : > { %v1349_v62 = vpop.f32.mrf.mxu0  ;;  %v1393_v63 = vpop.f32.mrf.mxu1 }
 0x350   : > { %1271 = vst.msk [vmem:[#allocation3 + $0x8] sm:$0xff] %vm758_vm0, %v1267_v61  ;;  %v1402_v2 = vsub.f32 %v1393_v63, %v1307_v50  ;;  %v1400_v9 = vsub.f32 %v1307_v50, %v1349_v62 }
 0x351   : > { %v2285_v3 = vpop.f32.mrf.mxu0  ;;  %v2291_v4 = vpop.f32.mrf.mxu1 }
 0x352   : > { %v1404_v5 = vsub.f32 %v1402_v2, %v1349_v62  ;;  %v1406_v27 = vmul.f32 %v1400_v9, %v3311_v11  ;;  %v1412_v28 = vmul.f32 %v1400_v9, %v3313_v12 }
 0x353   : > { %v1352_v6 = vpop.f32.mrf.mxu0  ;;  %v1396_v7 = vpop.f32.mrf.mxu1  ;;  %v1560_v8 = vld [vmem:[#allocation3] sm:$0xff] }
 0x354   : > { %v1403_v10 = vsub.f32 %v1396_v7, %v1310_v57  ;;  %v1401_v14 = vsub.f32 %v1310_v57, %v1352_v6  ;;  %v3372_v19 = vadd.f32 %v1560_v8, %v1556_v13  ;;  %v1408_v20 = vmul.f32 %v1404_v5, %v3313_v12 }
 0x355   : > { %v2286_v15 = vpop.f32.mrf.mxu0  ;;  %v2292_v18 = vpop.f32.mrf.mxu1  ;;  %v1414_v22 = vmul.f32 %v1404_v5, %v3311_v11 }
 0x356   : > { %v1405_v23 = vsub.f32 %v1403_v10, %v1352_v6  ;;  %v1407_v31 = vmul.f32 %v1401_v14, %v3315_v16  ;;  %v1413_v32 = vmul.f32 %v1401_v14, %v3317_v17  ;;  %v1410_v37 = vsub.f32 %v1406_v27, %v1408_v20 }
 0x357   : > { %v1561_v26 = vld [vmem:[#allocation3 + $0x8] sm:$0xff]  ;;  %v1416_v38 = vadd.f32 %v1414_v22, %v1412_v28 }
 0x358   : > { %v1679_v30 = vadd.f32 %v1561_v26, %v1557_v25  ;;  %v1409_v34 = vmul.f32 %v1405_v23, %v3317_v17  ;;  %v1415_v35 = vmul.f32 %v1405_v23, %v3315_v16  ;;  %v1564_v17 = vpack.c.bf16 %v1557_v25, %v1556_v13 }
 0x359   : > { %v1502_v39 = vadd.f32 %v1416_v38, %v1410_v37  ;;  %v1621_v16 = vpack.c.bf16 %v1561_v26, %v1560_v8 }
 0x35a   : > { %v1682_v36 = vpack.c.bf16 %v1679_v30, %v3372_v19  ;;  %v1411_v40 = vsub.f32 %v1407_v31, %v1409_v34  ;;  %v1417_v24 = vadd.f32 %v1415_v35, %v1413_v32 }
 0x35c   : > { %v1503_v29 = vadd.f32 %v1417_v24, %v1411_v40  ;;  %v1418_v33 = vpack.c.bf16 %v1411_v40, %v1410_v37  ;;  %v1460_v11 = vpack.c.bf16 %v1417_v24, %v1416_v38 }
 0x35e   : > { %2294 = vmatpush3.bf16.msra.mxu0 %v1418_v33  ;;  %2300 = vmatpush3.bf16.msra.mxu1 %v1460_v11  ;;  %v1504_v12 = vpack.c.bf16 %v1503_v29, %v1502_v39 }
 0x35f   : > { %2305 = vmatprep.subr.bf16.mxu0 %v2889_v21  ;;  %2311 = vmatprep.subr.bf16.mxu1 %v3243_v0 }
 0x361   : > { %2296 = vmatmul.mubr.msk.bf16.vlgmr.msra.gmra.mxu0 %vm758_vm0, %v3275_v41  ;;  %2302 = vmatmul.mubr.msk.bf16.vlgmr.msra.gmra.mxu1 %vm758_vm0, %v3296_v56  ;;  %v2549_v41 = vld [vmem:[#allocation15] sm:$0xff]  }
 0x362   : > { %2306 = vmatpush3.bf16.msra.mxu0 %v1504_v12  ;;  %2313 = vmatprep.mubr.msk.bf16.mxu1 %vm758_vm0, %v1564_v17 }
 0x363   : > { %2307 = vmatprep.mubr.msk.bf16.mxu0 %vm2890_vm1, %v2889_v21  ;;  %2312 = vmatpush3.bf16.msra.mxu1 %v3243_v0 }
 0x364   : > { %2317 = vmatprep.subr.bf16.mxu0 %v3248_v1  ;;  %2323 = vmatprep.subr.bf16.mxu1 %v2549_v41 }
 0x369   : > { %2308 = vmatmul.mubr.msk.bf16.vlgmr.msra.gmra.mxu0 %vm758_vm0, %v3342_v42 }
 0x36a   : > { %2319 = vmatprep.mubr.msk.bf16.mxu0 %vm758_vm0, %v1621_v16  ;;  %2318 = vmatpush3.bf16.msra.mxu0 %v3248_v1 }
 0x421   : > { %v1453_v56 = vpop.f32.mrf.mxu0  ;;  %v1495_v43 = vpop.f32.mrf.mxu1 }
 0x422   : > { %v1546_v44 = vadd.f32 %v1495_v43, %v1453_v56 }
 0x423   : > { %v2297_v45 = vpop.f32.mrf.mxu0  ;;  %v2303_v46 = vpop.f32.mrf.mxu1 }
 0x424   : > { %1552 = vst.msk [vmem:[#allocation2 + $0x10] sm:$0xff] %vm758_vm0, %v1546_v44 }
 0x425   : > { %v1456_v0 = vpop.f32.mrf.mxu0  ;;  %v1498_v21 = vpop.f32.mrf.mxu1 }
 0x426   : > { %v1547_v47 = vadd.f32 %v1498_v21, %v1456_v0 }
 0x427   : > { %v2298_v48 = vpop.f32.mrf.mxu0  ;;  %v2304_v49 = vpop.f32.mrf.mxu1 }
 0x428   : > { %1553 = vst.msk [vmem:[#allocation2 + $0x18] sm:$0xff] %vm758_vm0, %v1547_v47 }
 0x429   : > { %v1539_v42 = vpop.f32.mrf.mxu0 }
 0x42a   : > { %v1548_v50 = vsub.f32 %v1539_v42, %v1453_v56 }
 0x42b   : > { %v2309_v51 = vpop.f32.mrf.mxu0  ;;  %v1558_v55 = vld [vmem:[#allocation2 + $0x10] sm:$0xff] }
 0x42c   : > { %v1550_v1 = vadd.f32 %v1548_v50, %v1495_v43 }
 0x42d   : > { %v1542_v52 = vpop.f32.mrf.mxu0 }
 0x42e   : > { %1554 = vst.msk [vmem:[#allocation3 + $0x10] sm:$0xff] %vm758_vm0, %v1550_v1  ;;  %v1549_v53 = vsub.f32 %v1542_v52, %v1456_v0 }
 0x42f   : > { %v2310_v54 = vpop.f32.mrf.mxu0  ;;  %v1559_v57 = vld [vmem:[#allocation2 + $0x18] sm:$0xff] }
 0x430   : > { %v1551_v58 = vadd.f32 %v1549_v53, %v1498_v21  ;;  %v1565_v59 = vpack.c.bf16 %v1559_v57, %v1558_v55 }
 0x432   : > { %1555 = vst.msk [vmem:[#allocation3 + $0x18] sm:$0xff] %vm758_vm0, %v1551_v58  ;;  %2314 = vmatmul.mubr.msk.bf16.vlgmr.msra.gmra.mxu1 %vm758_vm0, %v1565_v59 }
 0x433   : > { %2325 = vmatprep.mubr.msk.bf16.mxu1 %vm758_vm0, %v1682_v36  ;;  %2324 = vmatpush3.bf16.msra.mxu1 %v2549_v41 }
 0x435   : > { %v1562_v60 = vld [vmem:[#allocation3 + $0x10] sm:$0xff] }
 0x436   : > { %v1680_v63 = vadd.f32 %v1562_v60, %v1558_v55 }
 0x439   : > { %v1563_v61 = vld [vmem:[#allocation3 + $0x18] sm:$0xff] }
 0x43a   : > { %v1622_v62 = vpack.c.bf16 %v1563_v61, %v1562_v60  ;;  %v1681_v2 = vadd.f32 %v1563_v61, %v1559_v57 }
 0x43c   : > { %2320 = vmatmul.mubr.msk.bf16.vlgmr.msra.gmra.mxu0 %vm758_vm0, %v1622_v62  ;;  %v1683_v3 = vpack.c.bf16 %v1681_v2, %v1680_v63 }
 0x43e   : > { %2326 = vmatmul.mubr.msk.bf16.vlgmr.msra.gmra.mxu1 %vm758_vm0, %v1683_v3 }
 0x4f2   : > { %v2315_v4 = vpop.f32.mrf.mxu1 }
 0x4f4   : > { %v1606_v5 = vpop.f32.mrf.mxu1 }
 0x4f6   : > { %v2316_v6 = vpop.f32.mrf.mxu1 }
 0x4f8   : > { %v1609_v7 = vpop.f32.mrf.mxu1 }
 0x4fc   : > { %v2321_v8 = vpop.f32.mrf.mxu0 }
 0x4fd   : > { %v1747_v9 = vadd.f32 %v2321_v8, %v2315_v4 }
 0x4fe   : > { %v1663_v10 = vpop.f32.mrf.mxu0  ;;  %v2327_v13 = vpop.f32.mrf.mxu1 }
 0x4ff   : > { %v1759_v14 = vmul.f32 0.00390625, %v1747_v9  ;;  %v1745_v15 = vadd.f32 %v1663_v10, %v1606_v5  ;;  %v1751_v18 = vsub.f32 %v2327_v13, %v2315_v4 }
 0x500   : > { %v2322_v19 = vpop.f32.mrf.mxu0  ;;  %v1730_v20 = vpop.f32.mrf.mxu1 }
 0x501   : > { %1763 = vst.msk [vmem:[%s3407_s2 + $0x10] sm:$0xff] %vm758_vm0, %v1759_v14  ;;  %v1757_v22 = vmul.f32 0.00390625, %v1745_v15  ;;  %v1755_v23 = vadd.f32 %v2321_v8, %v1751_v18  ;;  %v1748_v25 = vadd.f32 %v2322_v19, %v2316_v6  ;;  %v1749_v26 = vsub.f32 %v1730_v20, %v1606_v5 }
 0x502   : > { %v1666_v27 = vpop.f32.mrf.mxu0  ;;  %v2328_v28 = vpop.f32.mrf.mxu1 }
 0x503   : > { %1761 = vst.msk [vmem:[%s3407_s2] sm:$0xff] %vm758_vm0, %v1757_v22  ;;  %v1767_v30 = vmul.f32 0.00390625, %v1755_v23  ;;  %v1760_v31 = vmul.f32 0.00390625, %v1748_v25  ;;  %v1753_v32 = vadd.f32 %v1749_v26, %v1663_v10  ;;  %v1746_v34 = vadd.f32 %v1666_v27, %v1609_v7 }
 0x504   : > { %v1752_v35 = vsub.f32 %v2328_v28, %v2316_v6  ;;  %v1733_v36 = vpop.f32.mrf.mxu1 }
 0x505   : > { %1771 = vst.msk [vmem:[%s3414_s25 + $0x10] sm:$0xff] %vm758_vm0, %v1767_v30  ;;  %1764 = vst.msk [vmem:[%s3407_s2 + $0x18] sm:$0xff] %vm758_vm0, %v1760_v31  ;;  %v1765_v37 = vmul.f32 0.00390625, %v1753_v32  ;;  %v1758_v38 = vmul.f32 0.00390625, %v1746_v34  ;;  %v1750_v40 = vsub.f32 %v1733_v36, %v1609_v7 }
 0x506   : > { %v1756_v24 = vadd.f32 %v2322_v19, %v1752_v35 }
 0x507   : > { %1769 = vst.msk [vmem:[%s3414_s25] sm:$0xff] %vm758_vm0, %v1765_v37  ;;  %1762 = vst.msk [vmem:[%s3407_s2 + $0x8] sm:$0xff] %vm758_vm0, %v1758_v38  ;;  %v1754_v29 = vadd.f32 %v1750_v40, %v1666_v27 }
 0x508   : > { %v1768_v33 = vmul.f32 0.00390625, %v1756_v24 }
 0x509   : > { %v1766_v11 = vmul.f32 0.00390625, %v1754_v29 }
 0x50a   : > { %1772 = vst.msk [vmem:[%s3414_s25 + $0x18] sm:$0xff] %vm758_vm0, %v1768_v33 }
 0x50b   : > { %1770 = vst.msk [vmem:[%s3414_s25 + $0x8] sm:$0xff] %vm758_vm0, %v1766_v11 }
 0x50c   : > { %s3554_s17 = sld [smem:[#allocation46_spill]]  ;;  %s2177_s16 = sshll.u32 %s3553_s20, 8 }
 0x50d   : > { %s1805_s21 = sshll.u32 %s3407_s2, 4  ;;  %s3555_s15 = sld [smem:[#allocation53_spill]]  ;;  %s1806_s21 = int_to_ptr.vmem [resolvable:$true] %s1805_s21 }
 0x50e   : > { %s2891_s0 = smov 256   ;;  %s2892_s13 = smov 1536  }
 0x50f   : > { %s2893_s14 = smov 2   ;;  %s2894_s1 = smov 128  }
 0x510   : > { %s2895_s20 = smov 8   ;;  %s2896_s28 = smov 131072  }
 0x511   : > { %s2897_s19 = smov 0  }
 0x512   : > { %p3556_p8 = scmp.ne.s32.totalorder %s3554_s17, 0 }
 0x513   : > { %s1794_s22 = scalar_lea.hbm %s3555_s15, %s2177_s16 }
 0x514   : > { %2383 = sst [smem:[#allocation30]] (%p3556_p8), %s2891_s0 }
 0x515   : > { %2384 = sst [smem:[#allocation30 + $0x1]] (%p3556_p8), %s2892_s13 }
 0x516   : > { %2385 = sst [smem:[#allocation30 + $0x2]] (%p3556_p8), %s2893_s14 }
 0x517   : > { %2386 = sst [smem:[#allocation30 + $0x3]] (%p3556_p8), %s2894_s1 }
 0x518   : > { %2387 = sst [smem:[#allocation30 + $0x4]] (%p3556_p8), %s2894_s1 }
 0x519   : > { %2388 = sst [smem:[#allocation30 + $0x5]] (%p3556_p8), %s2895_s20 }
 0x51a   : > { %2389 = dma.general (%p3556_p8), %s1806_s21, 512, %s1794_s22, %s1774_s23, %s2896_s28, [#allocation30], %s2897_s19, 0  }
 0x51b   : > { %s3557_s3 = sld [smem:[#allocation54_spill]]  ;;  %s1847_s0 = sshll.u32 %s3414_s25, 4  ;;  %s1848_s0 = int_to_ptr.vmem [resolvable:$true] %s1847_s0 }
 0x51c   : > { %s2898_s13 = smov 256   ;;  %s2899_s14 = smov 1536  }
 0x51d   : > { %2390 = sst [smem:[#allocation32]] (%p3556_p8), %s2898_s13  ;;  %s2900_s23 = smov 2  }
 0x51e   : > { %2391 = sst [smem:[#allocation32 + $0x1]] (%p3556_p8), %s2899_s14  ;;  %s2901_s21 = smov 128  }
 0x51f   : > { %2392 = sst [smem:[#allocation32 + $0x2]] (%p3556_p8), %s2900_s23  ;;  %s2902_s22 = smov 8  }
 0x520   : > { %2393 = sst [smem:[#allocation32 + $0x3]] (%p3556_p8), %s2901_s21  ;;  %s2904_s25 = smov 0  }
 0x521   : > { %s1836_s15 = scalar_lea.hbm %s3557_s3, %s2177_s16  ;;  %2394 = sst [smem:[#allocation32 + $0x4]] (%p3556_p8), %s2901_s21 }
 0x522   : > { %2395 = sst [smem:[#allocation32 + $0x5]] (%p3556_p8), %s2902_s22  ;;  %s2903_s16 = smov 131072  }
 0x523   : > { %2396 = dma.general (%p3556_p8), %s1848_s0, 512, %s1836_s15, %s1779_s12, %s2903_s16, [#allocation32], %s2904_s25, 0  }
 0x524 PF: > { %s3558_s1 = sld [smem:[#allocation43_spill]]  ;;  %p2452_p13 = scmp.ge.s32.totalorder %s2862_s30, 2 }
 0x525   : > { %s3559_s20 = sld [smem:[#allocation48_spill]] }
 0x52a   : > { %s1875_s28 = sand.u32 1, %s3558_s1  }
 0x52b   : > { %p3560_p6 = scmp.ne.s32.totalorder %s3559_s20, 0  ;;  %s1876_s19 = scalar_lea.sflag [#allocation6], %s1875_s28 }
 0x52d   : > { %p2428_p7 = pnand %p2452_p13, %p3560_p6 }
 0x52f   : > { %p2429_p2 = pneg %p2428_p7 }
 0x531   : > { %2833 = dma.done.wait (%p2429_p2), %s1876_s19, 512  }
 0x532   : > { %2835 = vsyncadd (%p2429_p2), %s1876_s19, 4294966784  ;;  %s1885_s2 = scalar_lea.sflag [#allocation24], %s1875_s28 }
 0x533   : > { %2837 = dma.done.wait (%p2429_p2), %s1885_s2, 512  }
 0x534   : > { %2839 = vsyncadd (%p2429_p2), %s1885_s2, 4294966784  ;;  %s38_s30 = sadd.s32 1, %s2862_s30   ;;  %s3561_s24 = sld [smem:[#allocation47_spill]] }
 0x535   : > { %p35_p3 = scmp.ge.s32.totalorder %s38_s30, 8   ;;  %s3562_s12 = sld [smem:[#allocation45_spill]] }
 0x536   : > { %s3563_s25 = smov %s2846_s26  ;;  %s3564_s26 = smov %s2850_s27 }
 0x537   : > { %s3566_s28 = smov %s2858_s29  ;;  %37 = sbr.rel (!%p35_p3) target bundleno = 20 (0x14), region = 200 }
 0x53a   : > { %s3565_s27 = smov %s3561_s24 }
 0x53b   : > { %s3567_s29 = smov %s3562_s12 }
 0x53c   :  { %1890 = vsyncpa [#allocation5], 1 }
 0x53d   :  { %1892 = vsyncpa [#allocation5 + $0x1], 1 }
 0x53e   :  { %1893 = vsyncpa [#allocation8], 1 }
 0x53f   :  { %1894 = vsyncpa [#allocation11], 1 }
 0x540   :  { %1895 = vsyncpa [#allocation14], 1 }
 0x541   :  { %1896 = vsyncpa [#allocation17], 1 }
 0x542   :  { %1897 = vsyncpa [#allocation20], 1 }
 0x543   :  { %1899 = vsyncpa [#allocation20 + $0x1], 1 }
 0x544   :  { %1900 = vsyncpa [#allocation6], 1 }
 0x545   :  { %1902 = vsyncpa [#allocation6 + $0x1], 1 }
 0x546   :  { %1903 = vsyncpa [#allocation24], 1 }
 0x547   :  { %1905 = vsyncpa [#allocation24 + $0x1], 1 }

</bundles_post_ra>
